<compile_context>
chip_gen: v7x
topology: tpu7x:2x2x1
jax: 0.10.0
libtpu: 0.0.40
codegen_flags: <defaults>
</compile_context>

<pallas_src>
import functools

import jax
import jax.numpy as jnp
from jax.experimental import pallas as pl
from jax.experimental.pallas import tpu as pltpu


# ----------------------- fused LSTM stack + FC kernel ------------------------
def _fused_lstm_fc_kernel(*refs, num_layers, seq_len, b_block, hidden,
                          approx_sigmoid):
    T, Bp, H = seq_len, b_block, hidden
    n_in = 1 + 3 * num_layers + 2
    assert len(refs) == n_in + 1 + 2          # trace-time sanity check

    x_ref = refs[0]                            # (T, Bp, D_in) time-major block
    fc_w_ref = refs[1 + 3 * num_layers]        # (H, O)
    fc_b_ref = refs[2 + 3 * num_layers]        # (1, O)
    out_ref = refs[n_in]                       # (Bp, O)
    z_scr = refs[n_in + 1]                     # (T*Bp, 4H) f32
    seq_scr = refs[n_in + 2]                   # (T*Bp, H)  f32

    if approx_sigmoid:
        def sigmoid(v):                        # EUP exp + EUP approx recip
            return pl.reciprocal(1.0 + jnp.exp(-v), approx=True)
    else:
        def sigmoid(v):                        # exact (for correctness check)
            return 1.0 / (1.0 + jnp.exp(-v))

    sliced_gates = (H % 128 == 0)              # lane-aligned gate slices?
    if not sliced_gates:
        # Full-width compute + one select; mask built once (g block [2H,3H)).
        lane = jax.lax.broadcasted_iota(jnp.int32, (Bp, 4 * H), 1)
        g_mask = (lane >= 2 * H) & (lane < 3 * H)

    h = jnp.zeros((Bp, H), jnp.float32)
    for layer in range(num_layers):
        wih_ref = refs[1 + 3 * layer]          # (D_l, 4H)
        whh_ref = refs[2 + 3 * layer]          # (H, 4H)
        b_ref = refs[3 + 3 * layer]            # (1, 4H)

        # Layer input sequence (value is loaded before seq_scr is rewritten).
        if layer == 0:
            x_seq = x_ref[...].reshape(T * Bp, -1)
        else:
            x_seq = seq_scr[...]

        # Hoisted input projection + bias: one big MXU matmul per layer.
        z_scr[...] = (jnp.dot(x_seq, wih_ref[...],
                              preferred_element_type=jnp.float32)
                      + b_ref[...])

        whh = whh_ref[...]                     # resident for the layer
        last_layer = layer == num_layers - 1

        def cell(z_t, h, c, whh=whh):
            gates = z_t + jnp.dot(h, whh, preferred_element_type=jnp.float32)
            if sliced_gates:                   # lane-tile-aligned gate slices
                i_g = sigmoid(gates[:, 0 * H:1 * H])
                f_g = sigmoid(gates[:, 1 * H:2 * H])
                g_g = jnp.tanh(gates[:, 2 * H:3 * H])
                o_g = sigmoid(gates[:, 3 * H:4 * H])
            else:                              # H < 128: full width + select
                act = jnp.where(g_mask, jnp.tanh(gates), sigmoid(gates))
                i_g, f_g = act[:, 0 * H:1 * H], act[:, 1 * H:2 * H]
                g_g, o_g = act[:, 2 * H:3 * H], act[:, 3 * H:4 * H]
            c = f_g * c + i_g * g_g
            h = o_g * jnp.tanh(c)
            return h, c

        h = jnp.zeros((Bp, H), jnp.float32)    # zero initial state per layer
        c = jnp.zeros((Bp, H), jnp.float32)

        if T <= 16:                            # small T: full static unroll
            for t in range(T):
                z_t = z_scr[t * Bp:(t + 1) * Bp, :]     # tile-aligned view
                h, c = cell(z_t, h, c)
                if not last_layer:
                    seq_scr[t * Bp:(t + 1) * Bp, :] = h
        else:                                  # large T: partially unrolled
            def body(t, carry, last_layer=last_layer, cell=cell):
                h, c = carry
                row = pl.multiple_of(t * Bp, Bp)
                h, c = cell(z_scr[pl.ds(row, Bp), :], h, c)
                if not last_layer:
                    seq_scr[pl.ds(row, Bp), :] = h
                return (h, c)
            h, c = jax.lax.fori_loop(0, T, body, (h, c), unroll=4)

    # Fused FC head on the last timestep of the last layer: (Bp,H)@(H,O)+b.
    out_ref[...] = (jnp.dot(h, fc_w_ref[...], preferred_element_type=jnp.float32)
                    + fc_b_ref[...]).astype(out_ref.dtype)


# ------------------------------- call wrapper ---------------------------------
def _fused_forward(params, x_btd, *, b_block=8, approx_sigmoid=True):
    """x_btd: (B, T, input_size) -> (B, output_size) in one pallas_call."""
    B, T, D = x_btd.shape
    num_layers = len(params["lstm"])
    H = params["lstm"][0]["w_hh_t"].shape[0]
    O = params["fc_w_t"].shape[1]

    nb = pl.cdiv(B, b_block)                   # batch blocks (grid axis)
    Bp = nb * b_block
    # Time-major, batch padded to a full sublane tile multiple: (T, Bp, D).
    x_tbd = jnp.transpose(x_btd, (1, 0, 2))
    x_tbd = jnp.pad(x_tbd, ((0, 0), (0, Bp - B), (0, 0)))

    inputs = [x_tbd]
    for layer in params["lstm"]:
        inputs += [layer["w_ih_t"], layer["w_hh_t"], layer["bias"]]
    inputs += [params["fc_w_t"], params["fc_b"]]

    # VMEM budget: weights + z/seq scratch + double-buffered x/out blocks.
    f32 = 4
    weight_bytes = sum(int(a.size) for a in inputs[1:]) * f32
    x_block_bytes = T * b_block * D * f32 * 2
    out_block_bytes = b_block * O * f32 * 2
    scratch_bytes = T * b_block * (4 * H + H) * f32
    total = weight_bytes + x_block_bytes + out_block_bytes + scratch_bytes
    vmem_limit = int(min(48 * 2**20, max(8 * 2**20, 2 * total)))

    kernel = functools.partial(
        _fused_lstm_fc_kernel,
        num_layers=num_layers, seq_len=T, b_block=b_block, hidden=H,
        approx_sigmoid=approx_sigmoid)

    weight_specs = [pl.BlockSpec(memory_space=pltpu.MemorySpace.VMEM)] \
        * (3 * num_layers + 2)

    out = pl.pallas_call(
        kernel,
        out_shape=jax.ShapeDtypeStruct((Bp, O), jnp.float32),
        grid_spec=pltpu.PrefetchScalarGridSpec(
            num_scalar_prefetch=0,
            grid=(nb,),                                        # batch blocks
            in_specs=[pl.BlockSpec((T, b_block, D), lambda i: (0, i, 0))]
                     + weight_specs,
            out_specs=pl.BlockSpec((b_block, O), lambda i: (i, 0)),
            scratch_shapes=[
                pltpu.VMEM((T * b_block, 4 * H), jnp.float32),  # Z = X@Wih^T+b
                pltpu.VMEM((T * b_block, H), jnp.float32),      # hidden seq
            ]),
        compiler_params=pltpu.CompilerParams(
            dimension_semantics=("parallel",),                  # v7x: 2 TCs
            vmem_limit_bytes=vmem_limit),
    )(*inputs)
    return out[:B]


@functools.partial(jax.jit, static_argnames=("approx_sigmoid",))
def lstm_model_forward(params, x_btd, approx_sigmoid=True):
    """x_btd: (B, T, input_size) -> (B, output_size).  bidirectional=False."""
    return _fused_forward(params, x_btd, approx_sigmoid=approx_sigmoid)


# ------------------------------- parameter init -------------------------------
def init_lstm_model_params(key, input_size, hidden_size, output_size, num_layers):
    """Deterministic init mirroring nn.LSTM / nn.Linear parameter shapes."""
    params = {"lstm": []}
    bound = 1.0 / jnp.sqrt(jnp.float32(hidden_size))
    d_in = input_size
    for _ in range(num_layers):
        key, k1, k2, k3, k4 = jax.random.split(key, 5)
        w_ih = jax.random.uniform(k1, (4 * hidden_size, d_in), jnp.float32, -bound, bound)
        w_hh = jax.random.uniform(k2, (4 * hidden_size, hidden_size), jnp.float32, -bound, bound)
        b_ih = jax.random.uniform(k3, (4 * hidden_size,), jnp.float32, -bound, bound)
        b_hh = jax.random.uniform(k4, (4 * hidden_size,), jnp.float32, -bound, bound)
        params["lstm"].append({
            "w_ih_t": w_ih.T,                          # (D_in, 4H)
            "w_hh_t": w_hh.T,                          # (H, 4H)
            "bias": (b_ih + b_hh).reshape(1, -1),      # (1, 4H)
        })
        d_in = hidden_size
    key, k5, k6 = jax.random.split(key, 3)
    fb = 1.0 / jnp.sqrt(jnp.float32(hidden_size))
    fc_w = jax.random.uniform(k5, (output_size, hidden_size), jnp.float32, -fb, fb)
    fc_b = jax.random.uniform(k6, (output_size,), jnp.float32, -fb, fb)
    params["fc_w_t"] = fc_w.T                          # (H, O)
    params["fc_b"] = fc_b.reshape(1, -1)               # (1, O)
    return params


# ------------------------------- pure-JAX reference ---------------------------
def _reference_forward(params, x_btd):
    x = jnp.transpose(x_btd, (1, 0, 2))
    for layer in params["lstm"]:
        T, B, _ = x.shape
        H = layer["w_hh_t"].shape[0]

        def step(carry, x_t, layer=layer, H=H):
            h, c = carry
            gates = x_t @ layer["w_ih_t"] + h @ layer["w_hh_t"] + layer["bias"]
            i = jax.nn.sigmoid(gates[:, 0 * H:1 * H])
            f = jax.nn.sigmoid(gates[:, 1 * H:2 * H])
            g = jnp.tanh(gates[:, 2 * H:3 * H])
            o = jax.nn.sigmoid(gates[:, 3 * H:4 * H])
            c = f * c + i * g
            h = o * jnp.tanh(c)
            return (h, c), h

        init = (jnp.zeros((B, H), jnp.float32), jnp.zeros((B, H), jnp.float32))
        _, x = jax.lax.scan(step, init, x)
    return x[-1] @ params["fc_w_t"] + params["fc_b"]


if __name__ == "__main__":
    B, T = 2, 8
    INPUT_SIZE, HIDDEN_SIZE, OUTPUT_SIZE, NUM_LAYERS = 16, 32, 8, 2

    key = jax.random.PRNGKey(0)
    k_x, k_p = jax.random.split(key)
    x = jax.random.normal(k_x, (B, T, INPUT_SIZE), jnp.float32)
    params = init_lstm_model_params(k_p, INPUT_SIZE, HIDDEN_SIZE, OUTPUT_SIZE, NUM_LAYERS)

    ref = jax.block_until_ready(_reference_forward(params, x))

    # Exact-activation kernel path: tight agreement with the reference.
    out_exact = jax.block_until_ready(lstm_model_forward(params, x, approx_sigmoid=False))
    assert out_exact.shape == (B, OUTPUT_SIZE), out_exact.shape
    assert jnp.allclose(out_exact, ref, atol=1e-4, rtol=1e-4), \
        float(jnp.max(jnp.abs(out_exact - ref)))

    # Default fast path: EUP-approx sigmoid (pl.reciprocal approx) -> looser tol.
    out = jax.block_until_ready(lstm_model_forward(params, x))
    assert out.shape == (B, OUTPUT_SIZE), out.shape
    assert jnp.allclose(out, ref, atol=2e-2, rtol=2e-2), \
        float(jnp.max(jnp.abs(out - ref)))

    print("KERNEL_OK")
</pallas_src>

<mosaic_0001>
module attributes {stable_mosaic.version = 11 : i64} {
  func.func @_fused_lstm_fc_kernel(%arg0: i32, %arg1: memref<8x8x16xf32, #tpu.memory_space<vmem>>, %arg2: memref<16x128xf32, #tpu.memory_space<vmem>>, %arg3: memref<32x128xf32, #tpu.memory_space<vmem>>, %arg4: memref<1x128xf32, #tpu.memory_space<vmem>>, %arg5: memref<32x128xf32, #tpu.memory_space<vmem>>, %arg6: memref<32x128xf32, #tpu.memory_space<vmem>>, %arg7: memref<1x128xf32, #tpu.memory_space<vmem>>, %arg8: memref<32x8xf32, #tpu.memory_space<vmem>>, %arg9: memref<1x8xf32, #tpu.memory_space<vmem>>, %arg10: memref<8x8xf32, #tpu.memory_space<vmem>>, %arg11: memref<64x128xf32, #tpu.memory_space<vmem>>, %arg12: memref<64x32xf32, #tpu.memory_space<vmem>>) attributes {dimension_semantics = [#tpu.dimension_semantics<parallel>], iteration_bounds = array<i64: 1>, scalar_prefetch = 0 : i64, scratch_operands = 2 : i64, tpu.core_type = #tpu.core_type<tc>, window_params = [{transform_indices = @transform_0, window_bounds = array<i64: 8, 8, 16>}, {pipeline_mode = #tpu.pipeline_mode<synchronous>, transform_indices = @transform_1, window_bounds = array<i64: 16, 128>}, {pipeline_mode = #tpu.pipeline_mode<synchronous>, transform_indices = @transform_2, window_bounds = array<i64: 32, 128>}, {pipeline_mode = #tpu.pipeline_mode<synchronous>, transform_indices = @transform_3, window_bounds = array<i64: 1, 128>}, {pipeline_mode = #tpu.pipeline_mode<synchronous>, transform_indices = @transform_4, window_bounds = array<i64: 32, 128>}, {pipeline_mode = #tpu.pipeline_mode<synchronous>, transform_indices = @transform_5, window_bounds = array<i64: 32, 128>}, {pipeline_mode = #tpu.pipeline_mode<synchronous>, transform_indices = @transform_6, window_bounds = array<i64: 1, 128>}, {pipeline_mode = #tpu.pipeline_mode<synchronous>, transform_indices = @transform_7, window_bounds = array<i64: 32, 8>}, {pipeline_mode = #tpu.pipeline_mode<synchronous>, transform_indices = @transform_8, window_bounds = array<i64: 1, 8>}, {transform_indices = @transform_9, window_bounds = array<i64: 8, 8>}]} {
    %0 = tpu.iota {dimensions = array<i32: 1>} : vector<8x128xi32>
    %c64_i32 = arith.constant 64 : i32
    %1 = vector.broadcast %c64_i32 : i32 to vector<8x128xi32>
    %2 = arith.cmpi sge, %0, %1 : vector<8x128xi32>
    %c96_i32 = arith.constant 96 : i32
    %3 = vector.broadcast %c96_i32 : i32 to vector<8x128xi32>
    %4 = arith.cmpi slt, %0, %3 : vector<8x128xi32>
    %5 = arith.andi %2, %4 : vector<8x128xi1>
    %c0 = arith.constant 0 : index
    %c0_0 = arith.constant 0 : index
    %c0_1 = arith.constant 0 : index
    %6 = vector.load %arg1[%c0, %c0_0, %c0_1] : memref<8x8x16xf32, #tpu.memory_space<vmem>>, vector<8x8x16xf32>
    %7 = vector.shape_cast %6 : vector<8x8x16xf32> to vector<64x16xf32>
    %c0_2 = arith.constant 0 : index
    %c0_3 = arith.constant 0 : index
    %8 = vector.load %arg2[%c0_2, %c0_3] : memref<16x128xf32, #tpu.memory_space<vmem>>, vector<16x128xf32>
    %cst = arith.constant dense<0.000000e+00> : vector<64x128xf32>
    %9 = tpu.matmul %7, %8, %cst {dimension_numbers = #tpu.dot_dimension_numbers<[1], [0], [0], [1], [0, 0, 1, 1], [], []>} : vector<64x16xf32>, vector<16x128xf32>, vector<64x128xf32> -> vector<64x128xf32>
    %c0_4 = arith.constant 0 : index
    %c0_5 = arith.constant 0 : index
    %10 = vector.load %arg4[%c0_4, %c0_5] : memref<1x128xf32, #tpu.memory_space<vmem>>, vector<1x128xf32>
    %11 = vector.broadcast %10 : vector<1x128xf32> to vector<64x128xf32>
    %12 = arith.addf %9, %11 : vector<64x128xf32>
    %c0_6 = arith.constant 0 : index
    %c0_7 = arith.constant 0 : index
    %13 = vector.load %arg11[%c0_6, %c0_7] : memref<64x128xf32, #tpu.memory_space<vmem>>, vector<64x128xf32>
    tpu.vector_store %arg11[%c0_6, %c0_7], %12 {strides = array<i32>} : memref<64x128xf32, #tpu.memory_space<vmem>>, vector<64x128xf32>,
    %c0_8 = arith.constant 0 : index
    %c0_9 = arith.constant 0 : index
    %14 = vector.load %arg3[%c0_8, %c0_9] : memref<32x128xf32, #tpu.memory_space<vmem>>, vector<32x128xf32>
    %cst_10 = arith.constant 0.000000e+00 : f32
    %15 = vector.broadcast %cst_10 : f32 to vector<8x32xf32>
    %cst_11 = arith.constant 0.000000e+00 : f32
    %16 = vector.broadcast %cst_11 : f32 to vector<8x32xf32>
    %c0_12 = arith.constant 0 : index
    %c0_13 = arith.constant 0 : index
    %17 = vector.load %arg11[%c0_12, %c0_13] : memref<64x128xf32, #tpu.memory_space<vmem>>, vector<8x128xf32>
    %cst_14 = arith.constant dense<0.000000e+00> : vector<8x128xf32>
    %18 = tpu.matmul %15, %14, %cst_14 {dimension_numbers = #tpu.dot_dimension_numbers<[1], [0], [0], [1], [0, 0, 1, 1], [], []>} : vector<8x32xf32>, vector<32x128xf32>, vector<8x128xf32> -> vector<8x128xf32>
    %19 = arith.addf %17, %18 : vector<8x128xf32>
    %20 = math.tanh %19 : vector<8x128xf32>
    %cst_15 = arith.constant 0.000000e+00 : f32
    %21 = vector.broadcast %cst_15 : f32 to vector<8x128xf32>
    %22 = arith.subf %21, %19 : vector<8x128xf32>
    %23 = math.exp %22 : vector<8x128xf32>
    %cst_16 = arith.constant 1.000000e+00 : f32
    %24 = vector.broadcast %cst_16 : f32 to vector<8x128xf32>
    %25 = arith.addf %24, %23 : vector<8x128xf32>
    %cst_17 = arith.constant 1.000000e+00 : f32
    %26 = vector.broadcast %cst_17 : f32 to vector<8x128xf32>
    %27 = arith.divf %26, %25 : vector<8x128xf32>
    %28 = arith.select %5, %20, %27 : vector<8x128xi1>, vector<8x128xf32>
    %29 = vector.extract_strided_slice %28 {offsets = [0, 0], sizes = [8, 32], strides = [1, 1]} : vector<8x128xf32> to vector<8x32xf32>
    %30 = vector.extract_strided_slice %28 {offsets = [0, 32], sizes = [8, 32], strides = [1, 1]} : vector<8x128xf32> to vector<8x32xf32>
    %31 = vector.extract_strided_slice %28 {offsets = [0, 64], sizes = [8, 32], strides = [1, 1]} : vector<8x128xf32> to vector<8x32xf32>
    %32 = vector.extract_strided_slice %28 {offsets = [0, 96], sizes = [8, 32], strides = [1, 1]} : vector<8x128xf32> to vector<8x32xf32>
    %33 = arith.mulf %30, %16 : vector<8x32xf32>
    %34 = arith.mulf %29, %31 : vector<8x32xf32>
    %35 = arith.addf %33, %34 : vector<8x32xf32>
    %36 = math.tanh %35 : vector<8x32xf32>
    %37 = arith.mulf %32, %36 : vector<8x32xf32>
    %c0_18 = arith.constant 0 : index
    %c0_19 = arith.constant 0 : index
    %38 = vector.load %arg12[%c0_18, %c0_19] : memref<64x32xf32, #tpu.memory_space<vmem>>, vector<8x32xf32>
    tpu.vector_store %arg12[%c0_18, %c0_19], %37 {strides = array<i32>} : memref<64x32xf32, #tpu.memory_space<vmem>>, vector<8x32xf32>,
    %c8 = arith.constant 8 : index
    %c0_20 = arith.constant 0 : index
    %39 = vector.load %arg11[%c8, %c0_20] : memref<64x128xf32, #tpu.memory_space<vmem>>, vector<8x128xf32>
    %cst_21 = arith.constant dense<0.000000e+00> : vector<8x128xf32>
    %40 = tpu.matmul %37, %14, %cst_21 {dimension_numbers = #tpu.dot_dimension_numbers<[1], [0], [0], [1], [0, 0, 1, 1], [], []>} : vector<8x32xf32>, vector<32x128xf32>, vector<8x128xf32> -> vector<8x128xf32>
    %41 = arith.addf %39, %40 : vector<8x128xf32>
    %42 = math.tanh %41 : vector<8x128xf32>
    %cst_22 = arith.constant 0.000000e+00 : f32
    %43 = vector.broadcast %cst_22 : f32 to vector<8x128xf32>
    %44 = arith.subf %43, %41 : vector<8x128xf32>
    %45 = math.exp %44 : vector<8x128xf32>
    %cst_23 = arith.constant 1.000000e+00 : f32
    %46 = vector.broadcast %cst_23 : f32 to vector<8x128xf32>
    %47 = arith.addf %46, %45 : vector<8x128xf32>
    %cst_24 = arith.constant 1.000000e+00 : f32
    %48 = vector.broadcast %cst_24 : f32 to vector<8x128xf32>
    %49 = arith.divf %48, %47 : vector<8x128xf32>
    %50 = arith.select %5, %42, %49 : vector<8x128xi1>, vector<8x128xf32>
    %51 = vector.extract_strided_slice %50 {offsets = [0, 0], sizes = [8, 32], strides = [1, 1]} : vector<8x128xf32> to vector<8x32xf32>
    %52 = vector.extract_strided_slice %50 {offsets = [0, 32], sizes = [8, 32], strides = [1, 1]} : vector<8x128xf32> to vector<8x32xf32>
    %53 = vector.extract_strided_slice %50 {offsets = [0, 64], sizes = [8, 32], strides = [1, 1]} : vector<8x128xf32> to vector<8x32xf32>
    %54 = vector.extract_strided_slice %50 {offsets = [0, 96], sizes = [8, 32], strides = [1, 1]} : vector<8x128xf32> to vector<8x32xf32>
    %55 = arith.mulf %52, %35 : vector<8x32xf32>
    %56 = arith.mulf %51, %53 : vector<8x32xf32>
    %57 = arith.addf %55, %56 : vector<8x32xf32>
    %58 = math.tanh %57 : vector<8x32xf32>
    %59 = arith.mulf %54, %58 : vector<8x32xf32>
    %c8_25 = arith.constant 8 : index
    %c0_26 = arith.constant 0 : index
    %60 = vector.load %arg12[%c8_25, %c0_26] : memref<64x32xf32, #tpu.memory_space<vmem>>, vector<8x32xf32>
    tpu.vector_store %arg12[%c8_25, %c0_26], %59 {strides = array<i32>} : memref<64x32xf32, #tpu.memory_space<vmem>>, vector<8x32xf32>,
    %c16 = arith.constant 16 : index
    %c0_27 = arith.constant 0 : index
    %61 = vector.load %arg11[%c16, %c0_27] : memref<64x128xf32, #tpu.memory_space<vmem>>, vector<8x128xf32>
    %cst_28 = arith.constant dense<0.000000e+00> : vector<8x128xf32>
    %62 = tpu.matmul %59, %14, %cst_28 {dimension_numbers = #tpu.dot_dimension_numbers<[1], [0], [0], [1], [0, 0, 1, 1], [], []>} : vector<8x32xf32>, vector<32x128xf32>, vector<8x128xf32> -> vector<8x128xf32>
    %63 = arith.addf %61, %62 : vector<8x128xf32>
    %64 = math.tanh %63 : vector<8x128xf32>
    %cst_29 = arith.constant 0.000000e+00 : f32
    %65 = vector.broadcast %cst_29 : f32 to vector<8x128xf32>
    %66 = arith.subf %65, %63 : vector<8x128xf32>
    %67 = math.exp %66 : vector<8x128xf32>
    %cst_30 = arith.constant 1.000000e+00 : f32
    %68 = vector.broadcast %cst_30 : f32 to vector<8x128xf32>
    %69 = arith.addf %68, %67 : vector<8x128xf32>
    %cst_31 = arith.constant 1.000000e+00 : f32
    %70 = vector.broadcast %cst_31 : f32 to vector<8x128xf32>
    %71 = arith.divf %70, %69 : vector<8x128xf32>
    %72 = arith.select %5, %64, %71 : vector<8x128xi1>, vector<8x128xf32>
    %73 = vector.extract_strided_slice %72 {offsets = [0, 0], sizes = [8, 32], strides = [1, 1]} : vector<8x128xf32> to vector<8x32xf32>
    %74 = vector.extract_strided_slice %72 {offsets = [0, 32], sizes = [8, 32], strides = [1, 1]} : vector<8x128xf32> to vector<8x32xf32>
    %75 = vector.extract_strided_slice %72 {offsets = [0, 64], sizes = [8, 32], strides = [1, 1]} : vector<8x128xf32> to vector<8x32xf32>
    %76 = vector.extract_strided_slice %72 {offsets = [0, 96], sizes = [8, 32], strides = [1, 1]} : vector<8x128xf32> to vector<8x32xf32>
    %77 = arith.mulf %74, %57 : vector<8x32xf32>
    %78 = arith.mulf %73, %75 : vector<8x32xf32>
    %79 = arith.addf %77, %78 : vector<8x32xf32>
    %80 = math.tanh %79 : vector<8x32xf32>
    %81 = arith.mulf %76, %80 : vector<8x32xf32>
    %c16_32 = arith.constant 16 : index
    %c0_33 = arith.constant 0 : index
    %82 = vector.load %arg12[%c16_32, %c0_33] : memref<64x32xf32, #tpu.memory_space<vmem>>, vector<8x32xf32>
    tpu.vector_store %arg12[%c16_32, %c0_33], %81 {strides = array<i32>} : memref<64x32xf32, #tpu.memory_space<vmem>>, vector<8x32xf32>,
    %c24 = arith.constant 24 : index
    %c0_34 = arith.constant 0 : index
    %83 = vector.load %arg11[%c24, %c0_34] : memref<64x128xf32, #tpu.memory_space<vmem>>, vector<8x128xf32>
    %cst_35 = arith.constant dense<0.000000e+00> : vector<8x128xf32>
    %84 = tpu.matmul %81, %14, %cst_35 {dimension_numbers = #tpu.dot_dimension_numbers<[1], [0], [0], [1], [0, 0, 1, 1], [], []>} : vector<8x32xf32>, vector<32x128xf32>, vector<8x128xf32> -> vector<8x128xf32>
    %85 = arith.addf %83, %84 : vector<8x128xf32>
    %86 = math.tanh %85 : vector<8x128xf32>
    %cst_36 = arith.constant 0.000000e+00 : f32
    %87 = vector.broadcast %cst_36 : f32 to vector<8x128xf32>
    %88 = arith.subf %87, %85 : vector<8x128xf32>
    %89 = math.exp %88 : vector<8x128xf32>
    %cst_37 = arith.constant 1.000000e+00 : f32
    %90 = vector.broadcast %cst_37 : f32 to vector<8x128xf32>
    %91 = arith.addf %90, %89 : vector<8x128xf32>
    %cst_38 = arith.constant 1.000000e+00 : f32
    %92 = vector.broadcast %cst_38 : f32 to vector<8x128xf32>
    %93 = arith.divf %92, %91 : vector<8x128xf32>
    %94 = arith.select %5, %86, %93 : vector<8x128xi1>, vector<8x128xf32>
    %95 = vector.extract_strided_slice %94 {offsets = [0, 0], sizes = [8, 32], strides = [1, 1]} : vector<8x128xf32> to vector<8x32xf32>
    %96 = vector.extract_strided_slice %94 {offsets = [0, 32], sizes = [8, 32], strides = [1, 1]} : vector<8x128xf32> to vector<8x32xf32>
    %97 = vector.extract_strided_slice %94 {offsets = [0, 64], sizes = [8, 32], strides = [1, 1]} : vector<8x128xf32> to vector<8x32xf32>
    %98 = vector.extract_strided_slice %94 {offsets = [0, 96], sizes = [8, 32], strides = [1, 1]} : vector<8x128xf32> to vector<8x32xf32>
    %99 = arith.mulf %96, %79 : vector<8x32xf32>
    %100 = arith.mulf %95, %97 : vector<8x32xf32>
    %101 = arith.addf %99, %100 : vector<8x32xf32>
    %102 = math.tanh %101 : vector<8x32xf32>
    %103 = arith.mulf %98, %102 : vector<8x32xf32>
    %c24_39 = arith.constant 24 : index
    %c0_40 = arith.constant 0 : index
    %104 = vector.load %arg12[%c24_39, %c0_40] : memref<64x32xf32, #tpu.memory_space<vmem>>, vector<8x32xf32>
    tpu.vector_store %arg12[%c24_39, %c0_40], %103 {strides = array<i32>} : memref<64x32xf32, #tpu.memory_space<vmem>>, vector<8x32xf32>,
    %c32 = arith.constant 32 : index
    %c0_41 = arith.constant 0 : index
    %105 = vector.load %arg11[%c32, %c0_41] : memref<64x128xf32, #tpu.memory_space<vmem>>, vector<8x128xf32>
    %cst_42 = arith.constant dense<0.000000e+00> : vector<8x128xf32>
    %106 = tpu.matmul %103, %14, %cst_42 {dimension_numbers = #tpu.dot_dimension_numbers<[1], [0], [0], [1], [0, 0, 1, 1], [], []>} : vector<8x32xf32>, vector<32x128xf32>, vector<8x128xf32> -> vector<8x128xf32>
    %107 = arith.addf %105, %106 : vector<8x128xf32>
    %108 = math.tanh %107 : vector<8x128xf32>
    %cst_43 = arith.constant 0.000000e+00 : f32
    %109 = vector.broadcast %cst_43 : f32 to vector<8x128xf32>
    %110 = arith.subf %109, %107 : vector<8x128xf32>
    %111 = math.exp %110 : vector<8x128xf32>
    %cst_44 = arith.constant 1.000000e+00 : f32
    %112 = vector.broadcast %cst_44 : f32 to vector<8x128xf32>
    %113 = arith.addf %112, %111 : vector<8x128xf32>
    %cst_45 = arith.constant 1.000000e+00 : f32
    %114 = vector.broadcast %cst_45 : f32 to vector<8x128xf32>
    %115 = arith.divf %114, %113 : vector<8x128xf32>
    %116 = arith.select %5, %108, %115 : vector<8x128xi1>, vector<8x128xf32>
    %117 = vector.extract_strided_slice %116 {offsets = [0, 0], sizes = [8, 32], strides = [1, 1]} : vector<8x128xf32> to vector<8x32xf32>
    %118 = vector.extract_strided_slice %116 {offsets = [0, 32], sizes = [8, 32], strides = [1, 1]} : vector<8x128xf32> to vector<8x32xf32>
    %119 = vector.extract_strided_slice %116 {offsets = [0, 64], sizes = [8, 32], strides = [1, 1]} : vector<8x128xf32> to vector<8x32xf32>
    %120 = vector.extract_strided_slice %116 {offsets = [0, 96], sizes = [8, 32], strides = [1, 1]} : vector<8x128xf32> to vector<8x32xf32>
    %121 = arith.mulf %118, %101 : vector<8x32xf32>
    %122 = arith.mulf %117, %119 : vector<8x32xf32>
    %123 = arith.addf %121, %122 : vector<8x32xf32>
    %124 = math.tanh %123 : vector<8x32xf32>
    %125 = arith.mulf %120, %124 : vector<8x32xf32>
    %c32_46 = arith.constant 32 : index
    %c0_47 = arith.constant 0 : index
    %126 = vector.load %arg12[%c32_46, %c0_47] : memref<64x32xf32, #tpu.memory_space<vmem>>, vector<8x32xf32>
    tpu.vector_store %arg12[%c32_46, %c0_47], %125 {strides = array<i32>} : memref<64x32xf32, #tpu.memory_space<vmem>>, vector<8x32xf32>,
    %c40 = arith.constant 40 : index
    %c0_48 = arith.constant 0 : index
    %127 = vector.load %arg11[%c40, %c0_48] : memref<64x128xf32, #tpu.memory_space<vmem>>, vector<8x128xf32>
    %cst_49 = arith.constant dense<0.000000e+00> : vector<8x128xf32>
    %128 = tpu.matmul %125, %14, %cst_49 {dimension_numbers = #tpu.dot_dimension_numbers<[1], [0], [0], [1], [0, 0, 1, 1], [], []>} : vector<8x32xf32>, vector<32x128xf32>, vector<8x128xf32> -> vector<8x128xf32>
    %129 = arith.addf %127, %128 : vector<8x128xf32>
    %130 = math.tanh %129 : vector<8x128xf32>
    %cst_50 = arith.constant 0.000000e+00 : f32
    %131 = vector.broadcast %cst_50 : f32 to vector<8x128xf32>
    %132 = arith.subf %131, %129 : vector<8x128xf32>
    %133 = math.exp %132 : vector<8x128xf32>
    %cst_51 = arith.constant 1.000000e+00 : f32
    %134 = vector.broadcast %cst_51 : f32 to vector<8x128xf32>
    %135 = arith.addf %134, %133 : vector<8x128xf32>
    %cst_52 = arith.constant 1.000000e+00 : f32
    %136 = vector.broadcast %cst_52 : f32 to vector<8x128xf32>
    %137 = arith.divf %136, %135 : vector<8x128xf32>
    %138 = arith.select %5, %130, %137 : vector<8x128xi1>, vector<8x128xf32>
    %139 = vector.extract_strided_slice %138 {offsets = [0, 0], sizes = [8, 32], strides = [1, 1]} : vector<8x128xf32> to vector<8x32xf32>
    %140 = vector.extract_strided_slice %138 {offsets = [0, 32], sizes = [8, 32], strides = [1, 1]} : vector<8x128xf32> to vector<8x32xf32>
    %141 = vector.extract_strided_slice %138 {offsets = [0, 64], sizes = [8, 32], strides = [1, 1]} : vector<8x128xf32> to vector<8x32xf32>
    %142 = vector.extract_strided_slice %138 {offsets = [0, 96], sizes = [8, 32], strides = [1, 1]} : vector<8x128xf32> to vector<8x32xf32>
    %143 = arith.mulf %140, %123 : vector<8x32xf32>
    %144 = arith.mulf %139, %141 : vector<8x32xf32>
    %145 = arith.addf %143, %144 : vector<8x32xf32>
    %146 = math.tanh %145 : vector<8x32xf32>
    %147 = arith.mulf %142, %146 : vector<8x32xf32>
    %c40_53 = arith.constant 40 : index
    %c0_54 = arith.constant 0 : index
    %148 = vector.load %arg12[%c40_53, %c0_54] : memref<64x32xf32, #tpu.memory_space<vmem>>, vector<8x32xf32>
    tpu.vector_store %arg12[%c40_53, %c0_54], %147 {strides = array<i32>} : memref<64x32xf32, #tpu.memory_space<vmem>>, vector<8x32xf32>,
    %c48 = arith.constant 48 : index
    %c0_55 = arith.constant 0 : index
    %149 = vector.load %arg11[%c48, %c0_55] : memref<64x128xf32, #tpu.memory_space<vmem>>, vector<8x128xf32>
    %cst_56 = arith.constant dense<0.000000e+00> : vector<8x128xf32>
    %150 = tpu.matmul %147, %14, %cst_56 {dimension_numbers = #tpu.dot_dimension_numbers<[1], [0], [0], [1], [0, 0, 1, 1], [], []>} : vector<8x32xf32>, vector<32x128xf32>, vector<8x128xf32> -> vector<8x128xf32>
    %151 = arith.addf %149, %150 : vector<8x128xf32>
    %152 = math.tanh %151 : vector<8x128xf32>
    %cst_57 = arith.constant 0.000000e+00 : f32
    %153 = vector.broadcast %cst_57 : f32 to vector<8x128xf32>
    %154 = arith.subf %153, %151 : vector<8x128xf32>
    %155 = math.exp %154 : vector<8x128xf32>
    %cst_58 = arith.constant 1.000000e+00 : f32
    %156 = vector.broadcast %cst_58 : f32 to vector<8x128xf32>
    %157 = arith.addf %156, %155 : vector<8x128xf32>
    %cst_59 = arith.constant 1.000000e+00 : f32
    %158 = vector.broadcast %cst_59 : f32 to vector<8x128xf32>
    %159 = arith.divf %158, %157 : vector<8x128xf32>
    %160 = arith.select %5, %152, %159 : vector<8x128xi1>, vector<8x128xf32>
    %161 = vector.extract_strided_slice %160 {offsets = [0, 0], sizes = [8, 32], strides = [1, 1]} : vector<8x128xf32> to vector<8x32xf32>
    %162 = vector.extract_strided_slice %160 {offsets = [0, 32], sizes = [8, 32], strides = [1, 1]} : vector<8x128xf32> to vector<8x32xf32>
    %163 = vector.extract_strided_slice %160 {offsets = [0, 64], sizes = [8, 32], strides = [1, 1]} : vector<8x128xf32> to vector<8x32xf32>
    %164 = vector.extract_strided_slice %160 {offsets = [0, 96], sizes = [8, 32], strides = [1, 1]} : vector<8x128xf32> to vector<8x32xf32>
    %165 = arith.mulf %162, %145 : vector<8x32xf32>
    %166 = arith.mulf %161, %163 : vector<8x32xf32>
    %167 = arith.addf %165, %166 : vector<8x32xf32>
    %168 = math.tanh %167 : vector<8x32xf32>
    %169 = arith.mulf %164, %168 : vector<8x32xf32>
    %c48_60 = arith.constant 48 : index
    %c0_61 = arith.constant 0 : index
    %170 = vector.load %arg12[%c48_60, %c0_61] : memref<64x32xf32, #tpu.memory_space<vmem>>, vector<8x32xf32>
    tpu.vector_store %arg12[%c48_60, %c0_61], %169 {strides = array<i32>} : memref<64x32xf32, #tpu.memory_space<vmem>>, vector<8x32xf32>,
    %c56 = arith.constant 56 : index
    %c0_62 = arith.constant 0 : index
    %171 = vector.load %arg11[%c56, %c0_62] : memref<64x128xf32, #tpu.memory_space<vmem>>, vector<8x128xf32>
    %cst_63 = arith.constant dense<0.000000e+00> : vector<8x128xf32>
    %172 = tpu.matmul %169, %14, %cst_63 {dimension_numbers = #tpu.dot_dimension_numbers<[1], [0], [0], [1], [0, 0, 1, 1], [], []>} : vector<8x32xf32>, vector<32x128xf32>, vector<8x128xf32> -> vector<8x128xf32>
    %173 = arith.addf %171, %172 : vector<8x128xf32>
    %174 = math.tanh %173 : vector<8x128xf32>
    %cst_64 = arith.constant 0.000000e+00 : f32
    %175 = vector.broadcast %cst_64 : f32 to vector<8x128xf32>
    %176 = arith.subf %175, %173 : vector<8x128xf32>
    %177 = math.exp %176 : vector<8x128xf32>
    %cst_65 = arith.constant 1.000000e+00 : f32
    %178 = vector.broadcast %cst_65 : f32 to vector<8x128xf32>
    %179 = arith.addf %178, %177 : vector<8x128xf32>
    %cst_66 = arith.constant 1.000000e+00 : f32
    %180 = vector.broadcast %cst_66 : f32 to vector<8x128xf32>
    %181 = arith.divf %180, %179 : vector<8x128xf32>
    %182 = arith.select %5, %174, %181 : vector<8x128xi1>, vector<8x128xf32>
    %183 = vector.extract_strided_slice %182 {offsets = [0, 0], sizes = [8, 32], strides = [1, 1]} : vector<8x128xf32> to vector<8x32xf32>
    %184 = vector.extract_strided_slice %182 {offsets = [0, 32], sizes = [8, 32], strides = [1, 1]} : vector<8x128xf32> to vector<8x32xf32>
    %185 = vector.extract_strided_slice %182 {offsets = [0, 64], sizes = [8, 32], strides = [1, 1]} : vector<8x128xf32> to vector<8x32xf32>
    %186 = vector.extract_strided_slice %182 {offsets = [0, 96], sizes = [8, 32], strides = [1, 1]} : vector<8x128xf32> to vector<8x32xf32>
    %187 = arith.mulf %184, %167 : vector<8x32xf32>
    %188 = arith.mulf %183, %185 : vector<8x32xf32>
    %189 = arith.addf %187, %188 : vector<8x32xf32>
    %190 = math.tanh %189 : vector<8x32xf32>
    %191 = arith.mulf %186, %190 : vector<8x32xf32>
    %c56_67 = arith.constant 56 : index
    %c0_68 = arith.constant 0 : index
    %192 = vector.load %arg12[%c56_67, %c0_68] : memref<64x32xf32, #tpu.memory_space<vmem>>, vector<8x32xf32>
    tpu.vector_store %arg12[%c56_67, %c0_68], %191 {strides = array<i32>} : memref<64x32xf32, #tpu.memory_space<vmem>>, vector<8x32xf32>,
    %c0_69 = arith.constant 0 : index
    %c0_70 = arith.constant 0 : index
    %193 = vector.load %arg12[%c0_69, %c0_70] : memref<64x32xf32, #tpu.memory_space<vmem>>, vector<64x32xf32>
    %c0_71 = arith.constant 0 : index
    %c0_72 = arith.constant 0 : index
    %194 = vector.load %arg5[%c0_71, %c0_72] : memref<32x128xf32, #tpu.memory_space<vmem>>, vector<32x128xf32>
    %cst_73 = arith.constant dense<0.000000e+00> : vector<64x128xf32>
    %195 = tpu.matmul %193, %194, %cst_73 {dimension_numbers = #tpu.dot_dimension_numbers<[1], [0], [0], [1], [0, 0, 1, 1], [], []>} : vector<64x32xf32>, vector<32x128xf32>, vector<64x128xf32> -> vector<64x128xf32>
    %c0_74 = arith.constant 0 : index
    %c0_75 = arith.constant 0 : index
    %196 = vector.load %arg7[%c0_74, %c0_75] : memref<1x128xf32, #tpu.memory_space<vmem>>, vector<1x128xf32>
    %197 = vector.broadcast %196 : vector<1x128xf32> to vector<64x128xf32>
    %198 = arith.addf %195, %197 : vector<64x128xf32>
    %c0_76 = arith.constant 0 : index
    %c0_77 = arith.constant 0 : index
    %199 = vector.load %arg11[%c0_76, %c0_77] : memref<64x128xf32, #tpu.memory_space<vmem>>, vector<64x128xf32>
    tpu.vector_store %arg11[%c0_76, %c0_77], %198 {strides = array<i32>} : memref<64x128xf32, #tpu.memory_space<vmem>>, vector<64x128xf32>,
    %c0_78 = arith.constant 0 : index
    %c0_79 = arith.constant 0 : index
    %200 = vector.load %arg6[%c0_78, %c0_79] : memref<32x128xf32, #tpu.memory_space<vmem>>, vector<32x128xf32>
    %cst_80 = arith.constant 0.000000e+00 : f32
    %201 = vector.broadcast %cst_80 : f32 to vector<8x32xf32>
    %cst_81 = arith.constant 0.000000e+00 : f32
    %202 = vector.broadcast %cst_81 : f32 to vector<8x32xf32>
    %c0_82 = arith.constant 0 : index
    %c0_83 = arith.constant 0 : index
    %203 = vector.load %arg11[%c0_82, %c0_83] : memref<64x128xf32, #tpu.memory_space<vmem>>, vector<8x128xf32>
    %cst_84 = arith.constant dense<0.000000e+00> : vector<8x128xf32>
    %204 = tpu.matmul %201, %200, %cst_84 {dimension_numbers = #tpu.dot_dimension_numbers<[1], [0], [0], [1], [0, 0, 1, 1], [], []>} : vector<8x32xf32>, vector<32x128xf32>, vector<8x128xf32> -> vector<8x128xf32>
    %205 = arith.addf %203, %204 : vector<8x128xf32>
    %206 = math.tanh %205 : vector<8x128xf32>
    %cst_85 = arith.constant 0.000000e+00 : f32
    %207 = vector.broadcast %cst_85 : f32 to vector<8x128xf32>
    %208 = arith.subf %207, %205 : vector<8x128xf32>
    %209 = math.exp %208 : vector<8x128xf32>
    %cst_86 = arith.constant 1.000000e+00 : f32
    %210 = vector.broadcast %cst_86 : f32 to vector<8x128xf32>
    %211 = arith.addf %210, %209 : vector<8x128xf32>
    %cst_87 = arith.constant 1.000000e+00 : f32
    %212 = vector.broadcast %cst_87 : f32 to vector<8x128xf32>
    %213 = arith.divf %212, %211 : vector<8x128xf32>
    %214 = arith.select %5, %206, %213 : vector<8x128xi1>, vector<8x128xf32>
    %215 = vector.extract_strided_slice %214 {offsets = [0, 0], sizes = [8, 32], strides = [1, 1]} : vector<8x128xf32> to vector<8x32xf32>
    %216 = vector.extract_strided_slice %214 {offsets = [0, 32], sizes = [8, 32], strides = [1, 1]} : vector<8x128xf32> to vector<8x32xf32>
    %217 = vector.extract_strided_slice %214 {offsets = [0, 64], sizes = [8, 32], strides = [1, 1]} : vector<8x128xf32> to vector<8x32xf32>
    %218 = vector.extract_strided_slice %214 {offsets = [0, 96], sizes = [8, 32], strides = [1, 1]} : vector<8x128xf32> to vector<8x32xf32>
    %219 = arith.mulf %216, %202 : vector<8x32xf32>
    %220 = arith.mulf %215, %217 : vector<8x32xf32>
    %221 = arith.addf %219, %220 : vector<8x32xf32>
    %222 = math.tanh %221 : vector<8x32xf32>
    %223 = arith.mulf %218, %222 : vector<8x32xf32>
    %c8_88 = arith.constant 8 : index
    %c0_89 = arith.constant 0 : index
    %224 = vector.load %arg11[%c8_88, %c0_89] : memref<64x128xf32, #tpu.memory_space<vmem>>, vector<8x128xf32>
    %cst_90 = arith.constant dense<0.000000e+00> : vector<8x128xf32>
    %225 = tpu.matmul %223, %200, %cst_90 {dimension_numbers = #tpu.dot_dimension_numbers<[1], [0], [0], [1], [0, 0, 1, 1], [], []>} : vector<8x32xf32>, vector<32x128xf32>, vector<8x128xf32> -> vector<8x128xf32>
    %226 = arith.addf %224, %225 : vector<8x128xf32>
    %227 = math.tanh %226 : vector<8x128xf32>
    %cst_91 = arith.constant 0.000000e+00 : f32
    %228 = vector.broadcast %cst_91 : f32 to vector<8x128xf32>
    %229 = arith.subf %228, %226 : vector<8x128xf32>
    %230 = math.exp %229 : vector<8x128xf32>
    %cst_92 = arith.constant 1.000000e+00 : f32
    %231 = vector.broadcast %cst_92 : f32 to vector<8x128xf32>
    %232 = arith.addf %231, %230 : vector<8x128xf32>
    %cst_93 = arith.constant 1.000000e+00 : f32
    %233 = vector.broadcast %cst_93 : f32 to vector<8x128xf32>
    %234 = arith.divf %233, %232 : vector<8x128xf32>
    %235 = arith.select %5, %227, %234 : vector<8x128xi1>, vector<8x128xf32>
    %236 = vector.extract_strided_slice %235 {offsets = [0, 0], sizes = [8, 32], strides = [1, 1]} : vector<8x128xf32> to vector<8x32xf32>
    %237 = vector.extract_strided_slice %235 {offsets = [0, 32], sizes = [8, 32], strides = [1, 1]} : vector<8x128xf32> to vector<8x32xf32>
    %238 = vector.extract_strided_slice %235 {offsets = [0, 64], sizes = [8, 32], strides = [1, 1]} : vector<8x128xf32> to vector<8x32xf32>
    %239 = vector.extract_strided_slice %235 {offsets = [0, 96], sizes = [8, 32], strides = [1, 1]} : vector<8x128xf32> to vector<8x32xf32>
    %240 = arith.mulf %237, %221 : vector<8x32xf32>
    %241 = arith.mulf %236, %238 : vector<8x32xf32>
    %242 = arith.addf %240, %241 : vector<8x32xf32>
    %243 = math.tanh %242 : vector<8x32xf32>
    %244 = arith.mulf %239, %243 : vector<8x32xf32>
    %c16_94 = arith.constant 16 : index
    %c0_95 = arith.constant 0 : index
    %245 = vector.load %arg11[%c16_94, %c0_95] : memref<64x128xf32, #tpu.memory_space<vmem>>, vector<8x128xf32>
    %cst_96 = arith.constant dense<0.000000e+00> : vector<8x128xf32>
    %246 = tpu.matmul %244, %200, %cst_96 {dimension_numbers = #tpu.dot_dimension_numbers<[1], [0], [0], [1], [0, 0, 1, 1], [], []>} : vector<8x32xf32>, vector<32x128xf32>, vector<8x128xf32> -> vector<8x128xf32>
    %247 = arith.addf %245, %246 : vector<8x128xf32>
    %248 = math.tanh %247 : vector<8x128xf32>
    %cst_97 = arith.constant 0.000000e+00 : f32
    %249 = vector.broadcast %cst_97 : f32 to vector<8x128xf32>
    %250 = arith.subf %249, %247 : vector<8x128xf32>
    %251 = math.exp %250 : vector<8x128xf32>
    %cst_98 = arith.constant 1.000000e+00 : f32
    %252 = vector.broadcast %cst_98 : f32 to vector<8x128xf32>
    %253 = arith.addf %252, %251 : vector<8x128xf32>
    %cst_99 = arith.constant 1.000000e+00 : f32
    %254 = vector.broadcast %cst_99 : f32 to vector<8x128xf32>
    %255 = arith.divf %254, %253 : vector<8x128xf32>
    %256 = arith.select %5, %248, %255 : vector<8x128xi1>, vector<8x128xf32>
    %257 = vector.extract_strided_slice %256 {offsets = [0, 0], sizes = [8, 32], strides = [1, 1]} : vector<8x128xf32> to vector<8x32xf32>
    %258 = vector.extract_strided_slice %256 {offsets = [0, 32], sizes = [8, 32], strides = [1, 1]} : vector<8x128xf32> to vector<8x32xf32>
    %259 = vector.extract_strided_slice %256 {offsets = [0, 64], sizes = [8, 32], strides = [1, 1]} : vector<8x128xf32> to vector<8x32xf32>
    %260 = vector.extract_strided_slice %256 {offsets = [0, 96], sizes = [8, 32], strides = [1, 1]} : vector<8x128xf32> to vector<8x32xf32>
    %261 = arith.mulf %258, %242 : vector<8x32xf32>
    %262 = arith.mulf %257, %259 : vector<8x32xf32>
    %263 = arith.addf %261, %262 : vector<8x32xf32>
    %264 = math.tanh %263 : vector<8x32xf32>
    %265 = arith.mulf %260, %264 : vector<8x32xf32>
    %c24_100 = arith.constant 24 : index
    %c0_101 = arith.constant 0 : index
    %266 = vector.load %arg11[%c24_100, %c0_101] : memref<64x128xf32, #tpu.memory_space<vmem>>, vector<8x128xf32>
    %cst_102 = arith.constant dense<0.000000e+00> : vector<8x128xf32>
    %267 = tpu.matmul %265, %200, %cst_102 {dimension_numbers = #tpu.dot_dimension_numbers<[1], [0], [0], [1], [0, 0, 1, 1], [], []>} : vector<8x32xf32>, vector<32x128xf32>, vector<8x128xf32> -> vector<8x128xf32>
    %268 = arith.addf %266, %267 : vector<8x128xf32>
    %269 = math.tanh %268 : vector<8x128xf32>
    %cst_103 = arith.constant 0.000000e+00 : f32
    %270 = vector.broadcast %cst_103 : f32 to vector<8x128xf32>
    %271 = arith.subf %270, %268 : vector<8x128xf32>
    %272 = math.exp %271 : vector<8x128xf32>
    %cst_104 = arith.constant 1.000000e+00 : f32
    %273 = vector.broadcast %cst_104 : f32 to vector<8x128xf32>
    %274 = arith.addf %273, %272 : vector<8x128xf32>
    %cst_105 = arith.constant 1.000000e+00 : f32
    %275 = vector.broadcast %cst_105 : f32 to vector<8x128xf32>
    %276 = arith.divf %275, %274 : vector<8x128xf32>
    %277 = arith.select %5, %269, %276 : vector<8x128xi1>, vector<8x128xf32>
    %278 = vector.extract_strided_slice %277 {offsets = [0, 0], sizes = [8, 32], strides = [1, 1]} : vector<8x128xf32> to vector<8x32xf32>
    %279 = vector.extract_strided_slice %277 {offsets = [0, 32], sizes = [8, 32], strides = [1, 1]} : vector<8x128xf32> to vector<8x32xf32>
    %280 = vector.extract_strided_slice %277 {offsets = [0, 64], sizes = [8, 32], strides = [1, 1]} : vector<8x128xf32> to vector<8x32xf32>
    %281 = vector.extract_strided_slice %277 {offsets = [0, 96], sizes = [8, 32], strides = [1, 1]} : vector<8x128xf32> to vector<8x32xf32>
    %282 = arith.mulf %279, %263 : vector<8x32xf32>
    %283 = arith.mulf %278, %280 : vector<8x32xf32>
    %284 = arith.addf %282, %283 : vector<8x32xf32>
    %285 = math.tanh %284 : vector<8x32xf32>
    %286 = arith.mulf %281, %285 : vector<8x32xf32>
    %c32_106 = arith.constant 32 : index
    %c0_107 = arith.constant 0 : index
    %287 = vector.load %arg11[%c32_106, %c0_107] : memref<64x128xf32, #tpu.memory_space<vmem>>, vector<8x128xf32>
    %cst_108 = arith.constant dense<0.000000e+00> : vector<8x128xf32>
    %288 = tpu.matmul %286, %200, %cst_108 {dimension_numbers = #tpu.dot_dimension_numbers<[1], [0], [0], [1], [0, 0, 1, 1], [], []>} : vector<8x32xf32>, vector<32x128xf32>, vector<8x128xf32> -> vector<8x128xf32>
    %289 = arith.addf %287, %288 : vector<8x128xf32>
    %290 = math.tanh %289 : vector<8x128xf32>
    %cst_109 = arith.constant 0.000000e+00 : f32
    %291 = vector.broadcast %cst_109 : f32 to vector<8x128xf32>
    %292 = arith.subf %291, %289 : vector<8x128xf32>
    %293 = math.exp %292 : vector<8x128xf32>
    %cst_110 = arith.constant 1.000000e+00 : f32
    %294 = vector.broadcast %cst_110 : f32 to vector<8x128xf32>
    %295 = arith.addf %294, %293 : vector<8x128xf32>
    %cst_111 = arith.constant 1.000000e+00 : f32
    %296 = vector.broadcast %cst_111 : f32 to vector<8x128xf32>
    %297 = arith.divf %296, %295 : vector<8x128xf32>
    %298 = arith.select %5, %290, %297 : vector<8x128xi1>, vector<8x128xf32>
    %299 = vector.extract_strided_slice %298 {offsets = [0, 0], sizes = [8, 32], strides = [1, 1]} : vector<8x128xf32> to vector<8x32xf32>
    %300 = vector.extract_strided_slice %298 {offsets = [0, 32], sizes = [8, 32], strides = [1, 1]} : vector<8x128xf32> to vector<8x32xf32>
    %301 = vector.extract_strided_slice %298 {offsets = [0, 64], sizes = [8, 32], strides = [1, 1]} : vector<8x128xf32> to vector<8x32xf32>
    %302 = vector.extract_strided_slice %298 {offsets = [0, 96], sizes = [8, 32], strides = [1, 1]} : vector<8x128xf32> to vector<8x32xf32>
    %303 = arith.mulf %300, %284 : vector<8x32xf32>
    %304 = arith.mulf %299, %301 : vector<8x32xf32>
    %305 = arith.addf %303, %304 : vector<8x32xf32>
    %306 = math.tanh %305 : vector<8x32xf32>
    %307 = arith.mulf %302, %306 : vector<8x32xf32>
    %c40_112 = arith.constant 40 : index
    %c0_113 = arith.constant 0 : index
    %308 = vector.load %arg11[%c40_112, %c0_113] : memref<64x128xf32, #tpu.memory_space<vmem>>, vector<8x128xf32>
    %cst_114 = arith.constant dense<0.000000e+00> : vector<8x128xf32>
    %309 = tpu.matmul %307, %200, %cst_114 {dimension_numbers = #tpu.dot_dimension_numbers<[1], [0], [0], [1], [0, 0, 1, 1], [], []>} : vector<8x32xf32>, vector<32x128xf32>, vector<8x128xf32> -> vector<8x128xf32>
    %310 = arith.addf %308, %309 : vector<8x128xf32>
    %311 = math.tanh %310 : vector<8x128xf32>
    %cst_115 = arith.constant 0.000000e+00 : f32
    %312 = vector.broadcast %cst_115 : f32 to vector<8x128xf32>
    %313 = arith.subf %312, %310 : vector<8x128xf32>
    %314 = math.exp %313 : vector<8x128xf32>
    %cst_116 = arith.constant 1.000000e+00 : f32
    %315 = vector.broadcast %cst_116 : f32 to vector<8x128xf32>
    %316 = arith.addf %315, %314 : vector<8x128xf32>
    %cst_117 = arith.constant 1.000000e+00 : f32
    %317 = vector.broadcast %cst_117 : f32 to vector<8x128xf32>
    %318 = arith.divf %317, %316 : vector<8x128xf32>
    %319 = arith.select %5, %311, %318 : vector<8x128xi1>, vector<8x128xf32>
    %320 = vector.extract_strided_slice %319 {offsets = [0, 0], sizes = [8, 32], strides = [1, 1]} : vector<8x128xf32> to vector<8x32xf32>
    %321 = vector.extract_strided_slice %319 {offsets = [0, 32], sizes = [8, 32], strides = [1, 1]} : vector<8x128xf32> to vector<8x32xf32>
    %322 = vector.extract_strided_slice %319 {offsets = [0, 64], sizes = [8, 32], strides = [1, 1]} : vector<8x128xf32> to vector<8x32xf32>
    %323 = vector.extract_strided_slice %319 {offsets = [0, 96], sizes = [8, 32], strides = [1, 1]} : vector<8x128xf32> to vector<8x32xf32>
    %324 = arith.mulf %321, %305 : vector<8x32xf32>
    %325 = arith.mulf %320, %322 : vector<8x32xf32>
    %326 = arith.addf %324, %325 : vector<8x32xf32>
    %327 = math.tanh %326 : vector<8x32xf32>
    %328 = arith.mulf %323, %327 : vector<8x32xf32>
    %c48_118 = arith.constant 48 : index
    %c0_119 = arith.constant 0 : index
    %329 = vector.load %arg11[%c48_118, %c0_119] : memref<64x128xf32, #tpu.memory_space<vmem>>, vector<8x128xf32>
    %cst_120 = arith.constant dense<0.000000e+00> : vector<8x128xf32>
    %330 = tpu.matmul %328, %200, %cst_120 {dimension_numbers = #tpu.dot_dimension_numbers<[1], [0], [0], [1], [0, 0, 1, 1], [], []>} : vector<8x32xf32>, vector<32x128xf32>, vector<8x128xf32> -> vector<8x128xf32>
    %331 = arith.addf %329, %330 : vector<8x128xf32>
    %332 = math.tanh %331 : vector<8x128xf32>
    %cst_121 = arith.constant 0.000000e+00 : f32
    %333 = vector.broadcast %cst_121 : f32 to vector<8x128xf32>
    %334 = arith.subf %333, %331 : vector<8x128xf32>
    %335 = math.exp %334 : vector<8x128xf32>
    %cst_122 = arith.constant 1.000000e+00 : f32
    %336 = vector.broadcast %cst_122 : f32 to vector<8x128xf32>
    %337 = arith.addf %336, %335 : vector<8x128xf32>
    %cst_123 = arith.constant 1.000000e+00 : f32
    %338 = vector.broadcast %cst_123 : f32 to vector<8x128xf32>
    %339 = arith.divf %338, %337 : vector<8x128xf32>
    %340 = arith.select %5, %332, %339 : vector<8x128xi1>, vector<8x128xf32>
    %341 = vector.extract_strided_slice %340 {offsets = [0, 0], sizes = [8, 32], strides = [1, 1]} : vector<8x128xf32> to vector<8x32xf32>
    %342 = vector.extract_strided_slice %340 {offsets = [0, 32], sizes = [8, 32], strides = [1, 1]} : vector<8x128xf32> to vector<8x32xf32>
    %343 = vector.extract_strided_slice %340 {offsets = [0, 64], sizes = [8, 32], strides = [1, 1]} : vector<8x128xf32> to vector<8x32xf32>
    %344 = vector.extract_strided_slice %340 {offsets = [0, 96], sizes = [8, 32], strides = [1, 1]} : vector<8x128xf32> to vector<8x32xf32>
    %345 = arith.mulf %342, %326 : vector<8x32xf32>
    %346 = arith.mulf %341, %343 : vector<8x32xf32>
    %347 = arith.addf %345, %346 : vector<8x32xf32>
    %348 = math.tanh %347 : vector<8x32xf32>
    %349 = arith.mulf %344, %348 : vector<8x32xf32>
    %c56_124 = arith.constant 56 : index
    %c0_125 = arith.constant 0 : index
    %350 = vector.load %arg11[%c56_124, %c0_125] : memref<64x128xf32, #tpu.memory_space<vmem>>, vector<8x128xf32>
    %cst_126 = arith.constant dense<0.000000e+00> : vector<8x128xf32>
    %351 = tpu.matmul %349, %200, %cst_126 {dimension_numbers = #tpu.dot_dimension_numbers<[1], [0], [0], [1], [0, 0, 1, 1], [], []>} : vector<8x32xf32>, vector<32x128xf32>, vector<8x128xf32> -> vector<8x128xf32>
    %352 = arith.addf %350, %351 : vector<8x128xf32>
    %353 = math.tanh %352 : vector<8x128xf32>
    %cst_127 = arith.constant 0.000000e+00 : f32
    %354 = vector.broadcast %cst_127 : f32 to vector<8x128xf32>
    %355 = arith.subf %354, %352 : vector<8x128xf32>
    %356 = math.exp %355 : vector<8x128xf32>
    %cst_128 = arith.constant 1.000000e+00 : f32
    %357 = vector.broadcast %cst_128 : f32 to vector<8x128xf32>
    %358 = arith.addf %357, %356 : vector<8x128xf32>
    %cst_129 = arith.constant 1.000000e+00 : f32
    %359 = vector.broadcast %cst_129 : f32 to vector<8x128xf32>
    %360 = arith.divf %359, %358 : vector<8x128xf32>
    %361 = arith.select %5, %353, %360 : vector<8x128xi1>, vector<8x128xf32>
    %362 = vector.extract_strided_slice %361 {offsets = [0, 0], sizes = [8, 32], strides = [1, 1]} : vector<8x128xf32> to vector<8x32xf32>
    %363 = vector.extract_strided_slice %361 {offsets = [0, 32], sizes = [8, 32], strides = [1, 1]} : vector<8x128xf32> to vector<8x32xf32>
    %364 = vector.extract_strided_slice %361 {offsets = [0, 64], sizes = [8, 32], strides = [1, 1]} : vector<8x128xf32> to vector<8x32xf32>
    %365 = vector.extract_strided_slice %361 {offsets = [0, 96], sizes = [8, 32], strides = [1, 1]} : vector<8x128xf32> to vector<8x32xf32>
    %366 = arith.mulf %363, %347 : vector<8x32xf32>
    %367 = arith.mulf %362, %364 : vector<8x32xf32>
    %368 = arith.addf %366, %367 : vector<8x32xf32>
    %369 = math.tanh %368 : vector<8x32xf32>
    %370 = arith.mulf %365, %369 : vector<8x32xf32>
    %c0_130 = arith.constant 0 : index
    %c0_131 = arith.constant 0 : index
    %371 = vector.load %arg8[%c0_130, %c0_131] : memref<32x8xf32, #tpu.memory_space<vmem>>, vector<32x8xf32>
    %cst_132 = arith.constant dense<0.000000e+00> : vector<8x8xf32>
    %372 = tpu.matmul %370, %371, %cst_132 {dimension_numbers = #tpu.dot_dimension_numbers<[1], [0], [0], [1], [0, 0, 1, 1], [], []>} : vector<8x32xf32>, vector<32x8xf32>, vector<8x8xf32> -> vector<8x8xf32>
    %c0_133 = arith.constant 0 : index
    %c0_134 = arith.constant 0 : index
    %373 = vector.load %arg9[%c0_133, %c0_134] : memref<1x8xf32, #tpu.memory_space<vmem>>, vector<1x8xf32>
    %374 = vector.broadcast %373 : vector<1x8xf32> to vector<8x8xf32>
    %375 = arith.addf %372, %374 : vector<8x8xf32>
    %c0_135 = arith.constant 0 : index
    %c0_136 = arith.constant 0 : index
    %376 = vector.load %arg10[%c0_135, %c0_136] : memref<8x8xf32, #tpu.memory_space<vmem>>, vector<8x8xf32>
    tpu.vector_store %arg10[%c0_135, %c0_136], %375 {strides = array<i32>} : memref<8x8xf32, #tpu.memory_space<vmem>>, vector<8x8xf32>,
    return
  }
  func.func @transform_0(%arg0: i32) -> (i32, i32, i32) {
    %c0_i32 = arith.constant 0 : i32
    %c0_i32_0 = arith.constant 0 : i32
    %c0_i32_1 = arith.constant 0 : i32
    return %c0_i32, %arg0, %c0_i32_0 : i32, i32, i32
  }
  func.func @transform_1(%arg0: i32) -> (i32, i32) {
    %c0_i32 = arith.constant 0 : i32
    %c0_i32_0 = arith.constant 0 : i32
    %c0_i32_1 = arith.constant 0 : i32
    return %c0_i32, %c0_i32_0 : i32, i32
  }
  func.func @transform_2(%arg0: i32) -> (i32, i32) {
    %c0_i32 = arith.constant 0 : i32
    %c0_i32_0 = arith.constant 0 : i32
    %c0_i32_1 = arith.constant 0 : i32
    return %c0_i32, %c0_i32_0 : i32, i32
  }
  func.func @transform_3(%arg0: i32) -> (i32, i32) {
    %c0_i32 = arith.constant 0 : i32
    %c0_i32_0 = arith.constant 0 : i32
    %c0_i32_1 = arith.constant 0 : i32
    return %c0_i32, %c0_i32_0 : i32, i32
  }
  func.func @transform_4(%arg0: i32) -> (i32, i32) {
    %c0_i32 = arith.constant 0 : i32
    %c0_i32_0 = arith.constant 0 : i32
    %c0_i32_1 = arith.constant 0 : i32
    return %c0_i32, %c0_i32_0 : i32, i32
  }
  func.func @transform_5(%arg0: i32) -> (i32, i32) {
    %c0_i32 = arith.constant 0 : i32
    %c0_i32_0 = arith.constant 0 : i32
    %c0_i32_1 = arith.constant 0 : i32
    return %c0_i32, %c0_i32_0 : i32, i32
  }
  func.func @transform_6(%arg0: i32) -> (i32, i32) {
    %c0_i32 = arith.constant 0 : i32
    %c0_i32_0 = arith.constant 0 : i32
    %c0_i32_1 = arith.constant 0 : i32
    return %c0_i32, %c0_i32_0 : i32, i32
  }
  func.func @transform_7(%arg0: i32) -> (i32, i32) {
    %c0_i32 = arith.constant 0 : i32
    %c0_i32_0 = arith.constant 0 : i32
    %c0_i32_1 = arith.constant 0 : i32
    return %c0_i32, %c0_i32_0 : i32, i32
  }
  func.func @transform_8(%arg0: i32) -> (i32, i32) {
    %c0_i32 = arith.constant 0 : i32
    %c0_i32_0 = arith.constant 0 : i32
    %c0_i32_1 = arith.constant 0 : i32
    return %c0_i32, %c0_i32_0 : i32, i32
  }
  func.func @transform_9(%arg0: i32) -> (i32, i32) {
    %c0_i32 = arith.constant 0 : i32
    %c0_i32_0 = arith.constant 0 : i32
    return %arg0, %c0_i32 : i32, i32
  }
}

</mosaic_0001>

<bundles_post_ra>
// kernel: lstm_model_forward.1
= control target key start
LH: loop header
LB: loop body
LE: loop exit
PB: predicated region body
PF: predicated region fallthrough
CT: control target
= control target key end

     0   :  { %vm54_vm0 = vcmask 130048   ;;  %v2704_v0 = vmov 0.0|0.0   ;;  %vm2705_vm1 = vmmov 0   ;;  %v2706_v4 = vmov 0.0   ;;  %s2708_s25 = smov 32   ;;  %s3155_s1 = inlined_call_operand.vmem [shape: f32[16,128], index: 1, kind: input, shape index: {}]   ;;  %s3156_s2 = inlined_call_operand.vmem [shape: f32[32,128], index: 2, kind: input, shape index: {}]   ;;  %s3157_s0 = inlined_call_operand.vmem [shape: f32[8,8,16], index: 0, kind: input, shape index: {}]   ;;  %s3158_s3 = inlined_call_operand.vmem [shape: f32[1,128], index: 3, kind: input, shape index: {}]   ;;  %s3159_s4 = inlined_call_operand.vmem [shape: f32[32,128], index: 4, kind: input, shape index: {}]   ;;  %s3160_s5 = inlined_call_operand.vmem [shape: f32[32,128], index: 5, kind: input, shape index: {}]   ;;  %s3161_s6 = inlined_call_operand.vmem [shape: f32[1,128], index: 6, kind: input, shape index: {}]   ;;  %s3162_s7 = inlined_call_operand.vmem [shape: f32[32,8], index: 7, kind: input, shape index: {}]   ;;  %s3163_s8 = inlined_call_operand.vmem [shape: f32[1,8], index: 8, kind: input, shape index: {}]   ;;  %s3164_s9 = inlined_call_operand.vmem [shape: f32[8,8], index: 9, kind: output, shape index: {}]  }
   0x1   :  { %2461 = vmatprep.subr.bf16.mxu1 %v2704_v0  ;;  %v45_v1 = vld [vmem:[%s3155_s1] sm:$0xff]  ;;  %v46_v2 = vld [vmem:[%s3155_s1 + $0x8] sm:$0xff]  ;;  %2258 = vmatprep.mubr.msk.f32.mxu1 %vm2705_vm1, %v2706_v4  ;;  %v194_v9 = vld [vmem:[%s3156_s2 + $0x10] sm:$0xff]  ;;  %v32_v23 = vlaneseq  ;;  %vm197_vm5 = vcmask 261120   ;;  %vm2087_vm6 = vcmask 64512  }
   0x2   :  { %v192_v3 = vld [vmem:[%s3156_s2] sm:$0xff]  ;;  %v2457_v5 = vpack.c.bf16 %v46_v2, %v45_v1  ;;  %v193_v6 = vld [vmem:[%s3156_s2 + $0x8] sm:$0xff]  ;;  %v195_v10 = vld [vmem:[%s3156_s2 + $0x18] sm:$0xff] }
   0x3   :  { %v37_v7 = vld [vmem:[%s3157_s0] sm:$0xff]  ;;  %v2777_v8 = vpack.c.bf16 %v193_v6, %v192_v3  ;;  %v38_v11 = vld [vmem:[%s3157_s0 + $0x8] sm:$0xff]  ;;  %v2790_v12 = vpack.c.bf16 %v195_v10, %v194_v9  ;;  %v33_v25 = vand.u32 127, %v32_v23  ;;  %v39_v55 = vld [vmem:[%s3157_s0 + $0x10] sm:$0xff] }
   0x4   :  { %2238 = vmatprep.mubr.msk.f32.mxu0 %vm54_vm0, %v37_v7  ;;  %2458 = vmatprep.subr.bf16.mxu0 %v2457_v5  ;;  %v2811_v13 = vld [vmem:[%s3158_s3] ss:$0 sm:$0xff]  ;;  %s2707_s3 = smov 64   ;;  %v40_v56 = vld [vmem:[%s3157_s0 + $0x18] sm:$0xff]  ;;  %v42_v58 = vld [vmem:[%s3157_s0 + $0x28] sm:$0xff] }
   0x5   :  { %2463 = vmatpush3.bf16.msra.mxu1 %v2777_v8  ;;  %2460 = vmatpush3.bf16.msra.mxu0 %v2457_v5  ;;  %vm34_vm2 = vcmp.ge.s32.totalorder %v33_v25, 64  ;;  %vm35_vm3 = vcmp.lt.s32.totalorder %v33_v25, 96  ;;  %v41_v57 = vld [vmem:[%s3157_s0 + $0x20] sm:$0xff]  ;;  %v43_v59 = vld [vmem:[%s3157_s0 + $0x30] sm:$0xff]  ;;  %v44_v60 = vld [vmem:[%s3157_s0 + $0x38] sm:$0xff] }
   0x6   :  { %2464 = vmatprep.subr.bf16.mxu1 %v2704_v0  ;;  %2473 = vmatprep.subr.bf16.mxu0 %v2704_v0  ;;  %vm2814_vm4 = vmand %vm34_vm2, %vm35_vm3  ;;  %v2003_v26 = vld [vmem:[%s3162_s7 + $0x10] sm:$0xff] }
   0x8   :  { %2239 = vmatmul.mubr.msk.f32.vlgmr.msra.gmra.mrb[0].mxu0 %vm54_vm0, %v38_v11 }
   0x9   :  { %2466 = vmatpush3.bf16.msra.mxu1 %v2790_v12  ;;  %2475 = vmatpush3.bf16.msra.mxu0 %v2777_v8 }
   0xa   :  { %2467 = vmatprep.subr.bf16.mxu1 %v2704_v0  ;;  %2476 = vmatprep.subr.bf16.mxu0 %v2704_v0 }
   0xb   :  { %2241 = vmatprep.mubr.msk.f32.mxu0 %vm54_vm0, %v39_v55 }
   0xc   :  { %2259 = vmatmul.mubr.f32.vlgmr.msra.gmra.mrb[0].mxu1 %v2706_v4  ;;  %2242 = vmatmul.mubr.msk.f32.gmra.mrb[2].mxu0 %vm54_vm0, %v40_v56 }
   0xd   :  { %2469 = vmatpush3.bf16.msra.mxu1 %v2777_v8  ;;  %2269 = vmatprep.mubr.msk.f32.mxu1 %vm2705_vm1, %v2706_v4 }
   0xe   :  { %2470 = vmatprep.subr.bf16.mxu1 %v2704_v0  ;;  %2478 = vmatpush3.bf16.msra.mxu0 %v2790_v12 }
   0xf   :  { %2485 = vmatprep.subr.bf16.mxu0 %v2704_v0  ;;  %2244 = vmatprep.mubr.msk.f32.mxu0 %vm54_vm0, %v41_v57 }
  0x10   :  { %2245 = vmatmul.mubr.msk.f32.gmra.mrb[4].mxu0 %vm54_vm0, %v42_v58 }
  0x11   :  { %2472 = vmatpush3.bf16.msra.mxu1 %v2790_v12  ;;  %2247 = vmatprep.mubr.msk.f32.mxu0 %vm54_vm0, %v43_v59 }
  0x12   :  { %2479 = vmatprep.subr.bf16.mxu1 %v2704_v0 }
  0x14   :  { %2248 = vmatmul.mubr.msk.f32.gmra.mrb[6].mxu0 %vm54_vm0, %v44_v60 }
  0x15   :  { %2280 = vmatprep.mubr.msk.f32.mxu0 %vm2705_vm1, %v2706_v4 }
  0xdb   :  { %v2240_v14 = vpop.f32.mrb[0].mxu0 }
  0xdc   :  { %v145_v15 = vpop.f32.mrb[1].mxu0  ;;  %v151_v39 = vadd.f32 %v2240_v14, %v2811_v13 }
  0xdd   :  { %v146_v16 = vadd.f32 %v2811_v13, %v145_v15 }
  0xdf   :  { %v267_v17 = vpop.f32.mrb[0].mxu1  ;;  %v2243_v1 = vpop.f32.mrb[2].mxu0 }
  0xe0   :  { %v271_v18 = vadd.f32 %v267_v17, %v146_v16  ;;  %v2260_v19 = vpop.f32.mrb[1].mxu1  ;;  %v155_v2 = vpop.f32.mrb[3].mxu0 }
  0xe1   :  { %v156_v10 = vadd.f32 %v2811_v13, %v155_v2 }
  0xe2   :  { %v273_v20 = vsub.f32 0.0, %v271_v18 }
  0xe3   :  { %v2865_v3 = vpop.f32.mrb[4].mxu0 }
  0xe4   :  { %v274_v21 = vmul.f32 1.442695, %v273_v20  ;;  %v2867_v5 = vpop.f32.mrb[5].mxu0 }
  0xe6   :  { %2576 = vpow2.f32 %v274_v21 }
  0xe7   :  { %2578 = vtanh.f32 %v271_v18  ;;  %v2869_v6 = vpop.f32.mrb[6].mxu0 }
  0xe8   :  { %v2871_v7 = vpop.f32.mrb[7].mxu0 }
  0xf0   :  { %v2577_v22 = vpop.eup %2576 }
  0xf1   :  { %v276_v24 = vadd.f32 1.0, %v2577_v22  ;;  %v2579_v27 = vpop.eup %2578 }
  0xf3   :  { %2580 = vrcp.f32 %v276_v24 }
  0xfd   :  { %v2581_v28 = vpop.eup %2580 }
  0xfe   :  { %v279_v29 = vsel %vm2814_vm4, %v2579_v27, %v2581_v28 }
  0xff   :  { %282 = vrot.lane.b32.xlu0 %v279_v29, %s2707_s3  ;;  %v280_v32 = vmul.f32 0.0, %v279_v29 }
 0x171   :  { %v283_v30 = vpop.permute.xlu0 %282 }
 0x172   :  { %v285_v31 = vmul.f32 %v283_v30, %v279_v29 }
 0x174   :  { %287 = vrot.lane.b32.xlu0 %v285_v31, %s2708_s25 }
 0x1e6   :  { %v288_v33 = vpop.permute.xlu0 %287 }
 0x1e7   :  { %v290_v34 = vadd.f32 %v288_v33, %v280_v32  ;;  %v161_v33 = vadd.f32 %v2243_v1, %v2811_v13 }
 0x1e9   :  { %2582 = vtanh.f32 %v290_v34 }
 0x1f3   :  { %v2583_v35 = vpop.eup %2582 }
 0x1f4   :  { %293 = vrot.lane.b32.xlu1 %v2583_v35, %s2707_s3 }
 0x266   :  { %v294_v36 = vpop.permute.xlu1 %293 }
 0x267   :  { %v296_v37 = vmul.f32 %v294_v36, %v279_v29 }
 0x269   :  { %298 = vrot.lane.b32.xlu1 %v296_v37, %s2708_s25 }
 0x2db   :  { %v299_v38 = vpop.permute.xlu1 %298 }
 0x2dc   :  { %301 = vst.msk [vmem:[#allocation3] sm:$0xff] %vm197_vm5, %v299_v38  ;;  %2270 = vmatmul.mubr.msk.f32.vlgmr.msra.gmra.mrb[2].mxu1 %vm197_vm5, %v299_v38 }
 0x2dd   :  { %2481 = vmatpush3.bf16.msra.mxu1 %v2777_v8  ;;  %2291 = vmatprep.mubr.msk.f32.mxu1 %vm2705_vm1, %v2706_v4 }
 0x2de   :  { %2482 = vmatprep.subr.bf16.mxu1 %v2704_v0 }
 0x2e1   :  { %2484 = vmatpush3.bf16.msra.mxu1 %v2790_v12 }
 0x2e2   :  { %2491 = vmatprep.subr.bf16.mxu1 %v2704_v0 }
 0x3af   :  { %v371_v40 = vpop.f32.mrb[2].mxu1 }
 0x3b0   :  { %v375_v41 = vadd.f32 %v371_v40, %v151_v39  ;;  %v2271_v42 = vpop.f32.mrb[3].mxu1 }
 0x3b2   :  { %v377_v43 = vsub.f32 0.0, %v375_v41 }
 0x3b4   :  { %v378_v44 = vmul.f32 1.442695, %v377_v43 }
 0x3b6   :  { %2584 = vpow2.f32 %v378_v44 }
 0x3b7   :  { %2586 = vtanh.f32 %v375_v41 }
 0x3c0   :  { %v2585_v45 = vpop.eup %2584 }
 0x3c1   :  { %v380_v46 = vadd.f32 1.0, %v2585_v45  ;;  %v2587_v47 = vpop.eup %2586 }
 0x3c3   :  { %2588 = vrcp.f32 %v380_v46 }
 0x3cd   :  { %v2589_v48 = vpop.eup %2588 }
 0x3ce   :  { %v383_v49 = vsel %vm2814_vm4, %v2587_v47, %v2589_v48 }
 0x3cf   :  { %386 = vrot.lane.b32.xlu0 %v383_v49, %s2707_s3  ;;  %v384_v52 = vmul.f32 %v383_v49, %v290_v34 }
 0x441   :  { %v387_v50 = vpop.permute.xlu0 %386 }
 0x442   :  { %v389_v51 = vmul.f32 %v387_v50, %v383_v49 }
 0x444   :  { %391 = vrot.lane.b32.xlu1 %v389_v51, %s2708_s25 }
 0x4b6   :  { %v392_v53 = vpop.permute.xlu1 %391 }
 0x4b7   :  { %v394_v54 = vadd.f32 %v392_v53, %v384_v52  ;;  %v166_v53 = vadd.f32 %v2811_v13, %v2867_v5 }
 0x4b9   :  { %2590 = vtanh.f32 %v394_v54 }
 0x4c3   :  { %v2591_v61 = vpop.eup %2590 }
 0x4c4   :  { %397 = vrot.lane.b32.xlu0 %v2591_v61, %s2707_s3 }
 0x536   :  { %v398_v62 = vpop.permute.xlu0 %397 }
 0x537   :  { %v400_v63 = vmul.f32 %v398_v62, %v383_v49 }
 0x539   :  { %402 = vrot.lane.b32.xlu1 %v400_v63, %s2708_s25 }
 0x5ab   :  { %v403_v9 = vpop.permute.xlu1 %402 }
 0x5ac   :  { %405 = vst.msk [vmem:[#allocation3 + $0x8] sm:$0xff] %vm197_vm5, %v403_v9  ;;  %2281 = vmatmul.mubr.msk.f32.vlgmr.msra.gmra.mrb[8].mxu0 %vm197_vm5, %v403_v9 }
 0x5ad   :  { %2487 = vmatpush3.bf16.msra.mxu0 %v2777_v8  ;;  %2302 = vmatprep.mubr.msk.f32.mxu0 %vm2705_vm1, %v2706_v4 }
 0x5ae   :  { %2488 = vmatprep.subr.bf16.mxu0 %v2704_v0 }
 0x5b1   :  { %2490 = vmatpush3.bf16.msra.mxu0 %v2790_v12 }
 0x5b2   :  { %2497 = vmatprep.subr.bf16.mxu0 %v2704_v0 }
 0x67f   :  { %v475_v11 = vpop.f32.mrb[8].mxu0 }
 0x680   :  { %v479_v14 = vadd.f32 %v475_v11, %v156_v10  ;;  %v2282_v15 = vpop.f32.mrb[9].mxu0 }
 0x682   :  { %v481_v16 = vsub.f32 0.0, %v479_v14 }
 0x684   :  { %v482_v17 = vmul.f32 1.442695, %v481_v16 }
 0x686   :  { %2592 = vpow2.f32 %v482_v17  ;;  %v171_v17 = vadd.f32 %v2865_v3, %v2811_v13 }
 0x687   :  { %2594 = vtanh.f32 %v479_v14 }
 0x690   :  { %v2593_v18 = vpop.eup %2592 }
 0x691   :  { %v484_v19 = vadd.f32 1.0, %v2593_v18  ;;  %v2595_v20 = vpop.eup %2594 }
 0x693   :  { %2596 = vrcp.f32 %v484_v19 }
 0x69d   :  { %v2597_v21 = vpop.eup %2596 }
 0x69e   :  { %v487_v22 = vsel %vm2814_vm4, %v2595_v20, %v2597_v21 }
 0x69f   :  { %490 = vrot.lane.b32.xlu0 %v487_v22, %s2707_s3  ;;  %v488_v25 = vmul.f32 %v487_v22, %v394_v54 }
 0x711   :  { %v491_v23 = vpop.permute.xlu0 %490 }
 0x712   :  { %v493_v24 = vmul.f32 %v491_v23, %v487_v22 }
 0x714   :  { %495 = vrot.lane.b32.xlu1 %v493_v24, %s2708_s25 }
 0x786   :  { %v496_v27 = vpop.permute.xlu1 %495 }
 0x787   :  { %v498_v28 = vadd.f32 %v496_v27, %v488_v25 }
 0x789   :  { %2598 = vtanh.f32 %v498_v28 }
 0x793   :  { %v2599_v29 = vpop.eup %2598 }
 0x794   :  { %501 = vrot.lane.b32.xlu0 %v2599_v29, %s2707_s3 }
 0x806   :  { %v502_v30 = vpop.permute.xlu0 %501 }
 0x807   :  { %v504_v31 = vmul.f32 %v502_v30, %v487_v22 }
 0x809   :  { %506 = vrot.lane.b32.xlu1 %v504_v31, %s2708_s25  ;;  %v1038_v31 = vld [vmem:[%s3159_s4] sm:$0xff] }
 0x87b   :  { %v507_v32 = vpop.permute.xlu1 %506 }
 0x87c   :  { %509 = vst.msk [vmem:[#allocation3 + $0x10] sm:$0xff] %vm197_vm5, %v507_v32  ;;  %2292 = vmatmul.mubr.msk.f32.vlgmr.msra.gmra.mrb[4].mxu1 %vm197_vm5, %v507_v32  ;;  %v1039_v32 = vld [vmem:[%s3159_s4 + $0x8] sm:$0xff] }
 0x87d   :  { %2493 = vmatpush3.bf16.msra.mxu1 %v2777_v8  ;;  %2313 = vmatprep.mubr.msk.f32.mxu1 %vm2705_vm1, %v2706_v4 }
 0x87e   :  { %2494 = vmatprep.subr.bf16.mxu1 %v2704_v0 }
 0x881   :  { %2496 = vmatpush3.bf16.msra.mxu1 %v2790_v12 }
 0x882   :  { %2503 = vmatprep.subr.bf16.mxu1 %v2704_v0 }
 0x94f   :  { %v579_v34 = vpop.f32.mrb[4].mxu1 }
 0x950   :  { %v583_v35 = vadd.f32 %v579_v34, %v161_v33  ;;  %v2293_v36 = vpop.f32.mrb[5].mxu1  ;;  %v2509_v33 = vpack.c.bf16 %v1039_v32, %v1038_v31 }
 0x952   :  { %v585_v37 = vsub.f32 0.0, %v583_v35 }
 0x954   :  { %v586_v38 = vmul.f32 1.442695, %v585_v37  ;;  %v1040_v37 = vld [vmem:[%s3159_s4 + $0x10] sm:$0xff] }
 0x956   :  { %2600 = vpow2.f32 %v586_v38  ;;  %v1041_v38 = vld [vmem:[%s3159_s4 + $0x18] sm:$0xff] }
 0x957   :  { %2602 = vtanh.f32 %v583_v35 }
 0x960   :  { %v2601_v39 = vpop.eup %2600 }
 0x961   :  { %v588_v40 = vadd.f32 1.0, %v2601_v39  ;;  %v2603_v41 = vpop.eup %2602  ;;  %v2513_v39 = vpack.c.bf16 %v1041_v38, %v1040_v37 }
 0x963   :  { %2604 = vrcp.f32 %v588_v40 }
 0x96d   :  { %v2605_v42 = vpop.eup %2604 }
 0x96e   :  { %v591_v43 = vsel %vm2814_vm4, %v2603_v41, %v2605_v42  ;;  %v1030_v41 = vld [vmem:[#allocation3] sm:$0xff]  ;;  %v1031_v42 = vld [vmem:[#allocation3 + $0x8] sm:$0xff] }
 0x96f   :  { %594 = vrot.lane.b32.xlu0 %v591_v43, %s2707_s3  ;;  %v592_v46 = vmul.f32 %v591_v43, %v498_v28 }
 0x9e1   :  { %v595_v44 = vpop.permute.xlu0 %594 }
 0x9e2   :  { %v597_v45 = vmul.f32 %v595_v44, %v591_v43 }
 0x9e4   :  { %599 = vrot.lane.b32.xlu1 %v597_v45, %s2708_s25 }
 0xa56   :  { %v600_v47 = vpop.permute.xlu1 %599 }
 0xa57   :  { %v602_v48 = vadd.f32 %v600_v47, %v592_v46  ;;  %v176_v47 = vadd.f32 %v2811_v13, %v2871_v7 }
 0xa59   :  { %2606 = vtanh.f32 %v602_v48 }
 0xa63   :  { %v2607_v49 = vpop.eup %2606 }
 0xa64   :  { %605 = vrot.lane.b32.xlu0 %v2607_v49, %s2707_s3 }
 0xad6   :  { %v606_v50 = vpop.permute.xlu0 %605 }
 0xad7   :  { %v608_v51 = vmul.f32 %v606_v50, %v591_v43  ;;  %v1032_v43 = vld [vmem:[#allocation3 + $0x10] sm:$0xff] }
 0xad9   :  { %610 = vrot.lane.b32.xlu1 %v608_v51, %s2708_s25 }
 0xb4b   :  { %v611_v52 = vpop.permute.xlu1 %610 }
 0xb4c   :  { %613 = vst.msk [vmem:[#allocation3 + $0x18] sm:$0xff] %vm197_vm5, %v611_v52  ;;  %2303 = vmatmul.mubr.msk.f32.vlgmr.msra.gmra.mrb[10].mxu0 %vm197_vm5, %v611_v52 }
 0xb4d   :  { %2499 = vmatpush3.bf16.msra.mxu0 %v2777_v8  ;;  %2324 = vmatprep.mubr.msk.f32.mxu0 %vm2705_vm1, %v2706_v4 }
 0xb4e   :  { %2500 = vmatprep.subr.bf16.mxu0 %v2704_v0 }
 0xb51   :  { %2502 = vmatpush3.bf16.msra.mxu0 %v2790_v12 }
 0xb52   :  { %2510 = vmatprep.subr.bf16.mxu0 %v2509_v33 }
 0xb53   :  { %v1033_v44 = vld [vmem:[#allocation3 + $0x18] sm:$0xff] }
 0xc1f   :  { %v683_v54 = vpop.f32.mrb[10].mxu0 }
 0xc20   :  { %v687_v55 = vadd.f32 %v683_v54, %v166_v53  ;;  %v2304_v56 = vpop.f32.mrb[11].mxu0 }
 0xc22   :  { %v689_v57 = vsub.f32 0.0, %v687_v55 }
 0xc24   :  { %v690_v58 = vmul.f32 1.442695, %v689_v57 }
 0xc26   :  { %2608 = vpow2.f32 %v690_v58 }
 0xc27   :  { %2610 = vtanh.f32 %v687_v55 }
 0xc30   :  { %v2609_v59 = vpop.eup %2608 }
 0xc31   :  { %v692_v60 = vadd.f32 1.0, %v2609_v59  ;;  %v2611_v61 = vpop.eup %2610 }
 0xc33   :  { %2612 = vrcp.f32 %v692_v60 }
 0xc3d   :  { %v2613_v62 = vpop.eup %2612 }
 0xc3e   :  { %v695_v63 = vsel %vm2814_vm4, %v2611_v61, %v2613_v62 }
 0xc3f   :  { %698 = vrot.lane.b32.xlu0 %v695_v63, %s2707_s3  ;;  %v696_v5 = vmul.f32 %v695_v63, %v602_v48 }
 0xcb1   :  { %v699_v1 = vpop.permute.xlu0 %698 }
 0xcb2   :  { %v701_v2 = vmul.f32 %v699_v1, %v695_v63 }
 0xcb4   :  { %703 = vrot.lane.b32.xlu1 %v701_v2, %s2708_s25 }
 0xd26   :  { %v704_v9 = vpop.permute.xlu1 %703 }
 0xd27   :  { %v706_v10 = vadd.f32 %v704_v9, %v696_v5 }
 0xd29   :  { %2614 = vtanh.f32 %v706_v10 }
 0xd33   :  { %v2615_v11 = vpop.eup %2614 }
 0xd34   :  { %709 = vrot.lane.b32.xlu0 %v2615_v11, %s2707_s3  ;;  %v1186_v11 = vld [vmem:[%s3160_s5] sm:$0xff] }
 0xda6   :  { %v710_v14 = vpop.permute.xlu0 %709 }
 0xda7   :  { %v712_v15 = vmul.f32 %v710_v14, %v695_v63  ;;  %v1187_v14 = vld [vmem:[%s3160_s5 + $0x8] sm:$0xff] }
 0xda9   :  { %714 = vrot.lane.b32.xlu1 %v712_v15, %s2708_s25  ;;  %v2981_v15 = vpack.c.bf16 %v1187_v14, %v1186_v11 }
 0xe1b   :  { %v715_v16 = vpop.permute.xlu1 %714 }
 0xe1c   :  { %717 = vst.msk [vmem:[#allocation3 + $0x20] sm:$0xff] %vm197_vm5, %v715_v16  ;;  %2314 = vmatmul.mubr.msk.f32.vlgmr.msra.gmra.mrb[6].mxu1 %vm197_vm5, %v715_v16  ;;  %v1188_v16 = vld [vmem:[%s3160_s5 + $0x10] sm:$0xff] }
 0xe1d   :  { %2505 = vmatpush3.bf16.msra.mxu1 %v2777_v8  ;;  %2335 = vmatprep.mubr.msk.f32.mxu1 %vm2705_vm1, %v2706_v4 }
 0xe1e   :  { %2506 = vmatprep.subr.bf16.mxu1 %v2704_v0 }
 0xe21   :  { %2508 = vmatpush3.bf16.msra.mxu1 %v2790_v12 }
 0xe22   :  { %2517 = vmatprep.subr.bf16.mxu1 %v2704_v0 }
 0xe23   :  { %v1034_v45 = vld [vmem:[#allocation3 + $0x20] sm:$0xff] }
 0xeef   :  { %v787_v18 = vpop.f32.mrb[6].mxu1 }
 0xef0   :  { %v791_v19 = vadd.f32 %v787_v18, %v171_v17  ;;  %v2315_v20 = vpop.f32.mrb[7].mxu1  ;;  %v1189_v17 = vld [vmem:[%s3160_s5 + $0x18] sm:$0xff] }
 0xef1   :  { %v2991_v18 = vpack.c.bf16 %v1189_v17, %v1188_v16 }
 0xef2   :  { %v793_v21 = vsub.f32 0.0, %v791_v19 }
 0xef4   :  { %v794_v22 = vmul.f32 1.442695, %v793_v21 }
 0xef6   :  { %2616 = vpow2.f32 %v794_v22 }
 0xef7   :  { %2618 = vtanh.f32 %v791_v19 }
 0xf00   :  { %v2617_v23 = vpop.eup %2616 }
 0xf01   :  { %v796_v8 = vadd.f32 1.0, %v2617_v23  ;;  %v2619_v24 = vpop.eup %2618  ;;  %v181_v23 = vadd.f32 %v2869_v6, %v2811_v13 }
 0xf03   :  { %2620 = vrcp.f32 %v796_v8 }
 0xf0d   :  { %v2621_v25 = vpop.eup %2620 }
 0xf0e   :  { %v799_v12 = vsel %vm2814_vm4, %v2619_v24, %v2621_v25 }
 0xf0f   :  { %802 = vrot.lane.b32.xlu0 %v799_v12, %s2707_s3  ;;  %v800_v3 = vmul.f32 %v799_v12, %v706_v10 }
 0xf81   :  { %v803_v27 = vpop.permute.xlu0 %802 }
 0xf82   :  { %v805_v28 = vmul.f32 %v803_v27, %v799_v12 }
 0xf84   :  { %807 = vrot.lane.b32.xlu1 %v805_v28, %s2708_s25 }
 0xff6   :  { %v808_v29 = vpop.permute.xlu1 %807 }
 0xff7   :  { %v810_v30 = vadd.f32 %v808_v29, %v800_v3 }
 0xff9   :  { %2622 = vtanh.f32 %v810_v30 }
0x1003   :  { %v2623_v34 = vpop.eup %2622 }
0x1004   :  { %813 = vrot.lane.b32.xlu0 %v2623_v34, %s2707_s3 }
0x1076   :  { %v814_v35 = vpop.permute.xlu0 %813 }
0x1077   :  { %v816_v36 = vmul.f32 %v814_v35, %v799_v12  ;;  %v3017_v12 = vld [vmem:[%s3161_s6] ss:$0 sm:$0xff] }
0x1079   :  { %818 = vrot.lane.b32.xlu1 %v816_v36, %s2708_s25 }
0x10eb   :  { %v819_v40 = vpop.permute.xlu1 %818 }
0x10ec   :  { %821 = vst.msk [vmem:[#allocation3 + $0x28] sm:$0xff] %vm197_vm5, %v819_v40  ;;  %2325 = vmatmul.mubr.msk.f32.vlgmr.msra.gmra.mrb[12].mxu0 %vm197_vm5, %v819_v40 }
0x10ed   :  { %2512 = vmatpush3.bf16.msra.mxu0 %v2509_v33  ;;  %2346 = vmatprep.mubr.msk.f32.mxu0 %vm197_vm5, %v1030_v41 }
0x10ee   :  { %2514 = vmatprep.subr.bf16.mxu0 %v2513_v39 }
0x10f1   :  { %2516 = vmatpush3.bf16.msra.mxu0 %v2513_v39 }
0x10f2   :  { %2529 = vmatprep.subr.bf16.mxu0 %v2704_v0 }
0x10f3   :  { %v1035_v46 = vld [vmem:[#allocation3 + $0x28] sm:$0xff] }
0x10f4   :  { %2347 = vmatmul.mubr.msk.f32.vlgmr.msra.gmra.mrb[14].mxu0 %vm197_vm5, %v1031_v42 }
0x10f5   :  { %2349 = vmatprep.mubr.msk.f32.mxu0 %vm197_vm5, %v1032_v43  ;;  %2531 = vmatpush3.bf16.msra.mxu0 %v2981_v15 }
0x10f6   :  { %2532 = vmatprep.subr.bf16.mxu0 %v2704_v0 }
0x10f8   :  { %2350 = vmatmul.mubr.msk.f32.gmra.mrb[16].mxu0 %vm197_vm5, %v1033_v44 }
0x10f9   :  { %2352 = vmatprep.mubr.msk.f32.mxu0 %vm197_vm5, %v1034_v45  ;;  %2534 = vmatpush3.bf16.msra.mxu0 %v2991_v18 }
0x10fa   :  { %2541 = vmatprep.subr.bf16.mxu0 %v2704_v0 }
0x10fc   :  { %2353 = vmatmul.mubr.msk.f32.gmra.mrb[18].mxu0 %vm197_vm5, %v1035_v46 }
0x11bf   :  { %v891_v48 = vpop.f32.mrb[12].mxu0 }
0x11c0   :  { %v895_v49 = vadd.f32 %v891_v48, %v176_v47  ;;  %v2326_v50 = vpop.f32.mrb[13].mxu0 }
0x11c2   :  { %v897_v51 = vsub.f32 0.0, %v895_v49 }
0x11c4   :  { %v898_v52 = vmul.f32 1.442695, %v897_v51 }
0x11c6   :  { %2624 = vpow2.f32 %v898_v52 }
0x11c7   :  { %v2957_v53 = vpop.f32.mrb[14].mxu0  ;;  %2626 = vtanh.f32 %v895_v49 }
0x11c8   :  { %v1139_v54 = vpop.f32.mrb[15].mxu0 }
0x11c9   :  { %v1140_v27 = vadd.f32 %v3017_v12, %v1139_v54 }
0x11cb   :  { %v2959_v55 = vpop.f32.mrb[16].mxu0 }
0x11cc   :  { %v2961_v56 = vpop.f32.mrb[17].mxu0 }
0x11cf   :  { %v2963_v57 = vpop.f32.mrb[18].mxu0 }
0x11d0   :  { %v2625_v58 = vpop.eup %2624  ;;  %v2965_v59 = vpop.f32.mrb[19].mxu0 }
0x11d1   :  { %v900_v60 = vadd.f32 1.0, %v2625_v58  ;;  %v2627_v7 = vpop.eup %2626 }
0x11d3   :  { %2628 = vrcp.f32 %v900_v60 }
0x11dd   :  { %v2629_v61 = vpop.eup %2628 }
0x11de   :  { %v903_v62 = vsel %vm2814_vm4, %v2627_v7, %v2629_v61 }
0x11df   :  { %906 = vrot.lane.b32.xlu0 %v903_v62, %s2707_s3  ;;  %v904_v2 = vmul.f32 %v903_v62, %v810_v30 }
0x1251   :  { %v907_v63 = vpop.permute.xlu0 %906 }
0x1252   :  { %v909_v1 = vmul.f32 %v907_v63, %v903_v62  ;;  %v1145_v63 = vadd.f32 %v2957_v53, %v3017_v12 }
0x1254   :  { %911 = vrot.lane.b32.xlu1 %v909_v1, %s2708_s25 }
0x12c6   :  { %v912_v5 = vpop.permute.xlu1 %911 }
0x12c7   :  { %v2971_v9 = vadd.f32 %v912_v5, %v904_v2 }
0x12c9   :  { %2630 = vtanh.f32 %v2971_v9 }
0x12d3   :  { %v2631_v10 = vpop.eup %2630 }
0x12d4   :  { %917 = vrot.lane.b32.xlu0 %v2631_v10, %s2707_s3 }
0x1346   :  { %v918_v19 = vpop.permute.xlu0 %917 }
0x1347   :  { %v920_v20 = vmul.f32 %v918_v19, %v903_v62 }
0x1349   :  { %922 = vrot.lane.b32.xlu1 %v920_v20, %s2708_s25 }
0x13bb   :  { %v923_v21 = vpop.permute.xlu1 %922 }
0x13bc   :  { %925 = vst.msk [vmem:[#allocation3 + $0x30] sm:$0xff] %vm197_vm5, %v923_v21  ;;  %2336 = vmatmul.mubr.msk.f32.vlgmr.msra.gmra.mrb[8].mxu1 %vm197_vm5, %v923_v21 }
0x13bd   :  { %2519 = vmatpush3.bf16.msra.mxu1 %v2981_v15  ;;  %2366 = vmatprep.mubr.msk.f32.mxu1 %vm2705_vm1, %v2706_v4 }
0x13be   :  { %2520 = vmatprep.subr.bf16.mxu1 %v2704_v0 }
0x13c1   :  { %2522 = vmatpush3.bf16.msra.mxu1 %v2991_v18 }
0x13c2   :  { %2523 = vmatprep.subr.bf16.mxu1 %v2704_v0 }
0x13c3   :  { %v1036_v22 = vld [vmem:[#allocation3 + $0x30] sm:$0xff] }
0x13c4   :  { %2367 = vmatmul.mubr.f32.vlgmr.msra.gmra.mrb[10].mxu1 %v2706_v4  ;;  %2355 = vmatprep.mubr.msk.f32.mxu0 %vm197_vm5, %v1036_v22 }
0x13c5   :  { %2525 = vmatpush3.bf16.msra.mxu1 %v2981_v15  ;;  %2377 = vmatprep.mubr.msk.f32.mxu1 %vm2705_vm1, %v2706_v4 }
0x13c6   :  { %2526 = vmatprep.subr.bf16.mxu1 %v2704_v0 }
0x13c9   :  { %2528 = vmatpush3.bf16.msra.mxu1 %v2991_v18 }
0x13ca   :  { %2535 = vmatprep.subr.bf16.mxu1 %v2704_v0 }
0x148f   :  { %v995_v8 = vpop.f32.mrb[8].mxu1 }
0x1490   :  { %v999_v24 = vadd.f32 %v995_v8, %v181_v23  ;;  %v2337_v25 = vpop.f32.mrb[9].mxu1 }
0x1492   :  { %v1001_v37 = vsub.f32 0.0, %v999_v24 }
0x1494   :  { %v1002_v38 = vmul.f32 1.442695, %v1001_v37 }
0x1497   :  { %v1257_v28 = vpop.f32.mrb[10].mxu1 }
0x1498   :  { %v1261_v3 = vadd.f32 %v1257_v28, %v1140_v27  ;;  %v2368_v29 = vpop.f32.mrb[11].mxu1 }
0x149a   :  { %v1263_v30 = vsub.f32 0.0, %v1261_v3 }
0x149c   :  { %v1264_v31 = vmul.f32 1.442695, %v1263_v30 }
0x149e   :  { %2632 = vpow2.f32 %v1264_v31  ;;  %v1150_v31 = vadd.f32 %v3017_v12, %v2961_v56 }
0x149f   :  { %2634 = vtanh.f32 %v1261_v3 }
0x14a8   :  { %v2633_v32 = vpop.eup %2632 }
0x14a9   :  { %v1266_v33 = vadd.f32 1.0, %v2633_v32  ;;  %v2635_v13 = vpop.eup %2634 }
0x14ab   :  { %2636 = vrcp.f32 %v1266_v33 }
0x14ac   :  { %2638 = vpow2.f32 %v1002_v38 }
0x14b5   :  { %v2637_v6 = vpop.eup %2636 }
0x14b6   :  { %v1269_v34 = vsel %vm2814_vm4, %v2635_v13, %v2637_v6  ;;  %v2639_v39 = vpop.eup %2638 }
0x14b7   :  { %1272 = vrot.lane.b32.xlu0 %v1269_v34, %s2707_s3  ;;  %v1270_v40 = vmul.f32 0.0, %v1269_v34  ;;  %v1004_v41 = vadd.f32 1.0, %v2639_v39 }
0x1529   :  { %v1273_v35 = vpop.permute.xlu0 %1272 }
0x152a   :  { %v1275_v36 = vmul.f32 %v1273_v35, %v1269_v34 }
0x152c   :  { %1277 = vrot.lane.b32.xlu1 %v1275_v36, %s2708_s25 }
0x159e   :  { %v1278_v42 = vpop.permute.xlu1 %1277 }
0x159f   :  { %v1280_v43 = vadd.f32 %v1278_v42, %v1270_v40 }
0x15a1   :  { %2640 = vtanh.f32 %v1280_v43 }
0x15a2   :  { %2642 = vrcp.f32 %v1004_v41 }
0x15a3   :  { %2644 = vtanh.f32 %v999_v24 }
0x15ab   :  { %v2641_v44 = vpop.eup %2640 }
0x15ac   :  { %v2643_v45 = vpop.eup %2642  ;;  %1283 = vrot.lane.b32.xlu0 %v2641_v44, %s2707_s3 }
0x15ad   :  { %v2645_v46 = vpop.eup %2644 }
0x15ae   :  { %v1007_v47 = vsel %vm2814_vm4, %v2645_v46, %v2643_v45 }
0x15af   :  { %v1008_v54 = vmul.f32 %v1007_v47, %v2971_v9 }
0x15b0   :  { %1010 = vrot.lane.b32.xlu0 %v1007_v47, %s2707_s3 }
0x161e   :  { %v1284_v48 = vpop.permute.xlu0 %1283 }
0x161f   :  { %v1286_v49 = vmul.f32 %v1284_v48, %v1269_v34  ;;  %v1155_v48 = vadd.f32 %v2959_v55, %v3017_v12 }
0x1621   :  { %1289 = vrot.lane.b32.xlu1 %v1286_v49, %s2708_s25 }
0x1622   :  { %v1011_v50 = vpop.permute.xlu0 %1010 }
0x1623   :  { %v1013_v51 = vmul.f32 %v1011_v50, %v1007_v47 }
0x1625   :  { %1015 = vrot.lane.b32.xlu0 %v1013_v51, %s2708_s25 }
0x1693   :  { %v1290_v52 = vpop.permute.xlu1 %1289 }
0x1694   :  { %2378 = vmatmul.mubr.msk.f32.vlgmr.msra.gmra.mrb[12].mxu1 %vm197_vm5, %v1290_v52 }
0x1695   :  { %2537 = vmatpush3.bf16.msra.mxu1 %v2981_v15  ;;  %2399 = vmatprep.mubr.msk.f32.mxu1 %vm2705_vm1, %v2706_v4 }
0x1696   :  { %2538 = vmatprep.subr.bf16.mxu1 %v2704_v0 }
0x1697   :  { %v1016_v58 = vpop.permute.xlu0 %1015 }
0x1698   :  { %v1018_v60 = vadd.f32 %v1016_v58, %v1008_v54 }
0x1699   :  { %2540 = vmatpush3.bf16.msra.mxu1 %v2991_v18 }
0x169a   :  { %2646 = vtanh.f32 %v1018_v60  ;;  %2547 = vmatprep.subr.bf16.mxu1 %v2704_v0 }
0x16a4   :  { %v2647_v7 = vpop.eup %2646 }
0x16a5   :  { %1021 = vrot.lane.b32.xlu0 %v2647_v7, %s2707_s3 }
0x1717   :  { %v1022_v61 = vpop.permute.xlu0 %1021 }
0x1718   :  { %v1024_v62 = vmul.f32 %v1022_v61, %v1007_v47 }
0x171a   :  { %1026 = vrot.lane.b32.xlu0 %v1024_v62, %s2708_s25 }
0x1767   :  { %v1359_v1 = vpop.f32.mrb[12].mxu1 }
0x1768   :  { %v1363_v2 = vadd.f32 %v1359_v1, %v1145_v63  ;;  %v2379_v5 = vpop.f32.mrb[13].mxu1 }
0x176a   :  { %v1365_v9 = vsub.f32 0.0, %v1363_v2 }
0x176c   :  { %v1366_v10 = vmul.f32 1.442695, %v1365_v9 }
0x176e   :  { %2648 = vpow2.f32 %v1366_v10 }
0x176f   :  { %2650 = vtanh.f32 %v1363_v2 }
0x1778   :  { %v2649_v11 = vpop.eup %2648 }
0x1779   :  { %v1368_v14 = vadd.f32 1.0, %v2649_v11  ;;  %v2651_v16 = vpop.eup %2650 }
0x177b   :  { %2652 = vrcp.f32 %v1368_v14 }
0x1785   :  { %v2653_v17 = vpop.eup %2652 }
0x1786   :  { %v1371_v19 = vsel %vm2814_vm4, %v2651_v16, %v2653_v17  ;;  %v1160_v16 = vadd.f32 %v3017_v12, %v2965_v59 }
0x1787   :  { %1374 = vrot.lane.b32.xlu1 %v1371_v19, %s2707_s3  ;;  %v1372_v24 = vmul.f32 %v1371_v19, %v1280_v43 }
0x178c   :  { %v1027_v20 = vpop.permute.xlu0 %1026 }
0x178d   :  { %1029 = vst.msk [vmem:[#allocation3 + $0x38] sm:$0xff] %vm197_vm5, %v1027_v20 }
0x1794   :  { %v1037_v53 = vld [vmem:[#allocation3 + $0x38] sm:$0xff] }
0x1795   :  { %2356 = vmatmul.mubr.msk.f32.gmra.mrb[20].mxu0 %vm197_vm5, %v1037_v53 }
0x1796   :  { %2388 = vmatprep.mubr.msk.f32.mxu0 %vm2705_vm1, %v2706_v4 }
0x17f9   :  { %v1375_v21 = vpop.permute.xlu1 %1374 }
0x17fa   :  { %v1377_v22 = vmul.f32 %v1375_v21, %v1371_v19 }
0x17fc   :  { %1379 = vrot.lane.b32.xlu1 %v1377_v22, %s2708_s25 }
0x1868   :  { %v3050_v23 = vpop.f32.mrb[20].mxu0 }
0x1869   :  { %v3052_v8 = vpop.f32.mrb[21].mxu0 }
0x186e   :  { %v1380_v25 = vpop.permute.xlu1 %1379 }
0x186f   :  { %v1382_v27 = vadd.f32 %v1380_v25, %v1372_v24 }
0x1871   :  { %2654 = vtanh.f32 %v1382_v27 }
0x187b   :  { %v2655_v28 = vpop.eup %2654 }
0x187c   :  { %1385 = vrot.lane.b32.xlu1 %v2655_v28, %s2707_s3 }
0x18ee   :  { %v1386_v3 = vpop.permute.xlu1 %1385 }
0x18ef   :  { %v1388_v29 = vmul.f32 %v1386_v3, %v1371_v19 }
0x18f1   :  { %1391 = vrot.lane.b32.xlu1 %v1388_v29, %s2708_s25 }
0x1963   :  { %v1392_v30 = vpop.permute.xlu1 %1391 }
0x1964   :  { %2389 = vmatmul.mubr.msk.f32.vlgmr.msra.gmra.mrb[22].mxu0 %vm197_vm5, %v1392_v30 }
0x1965   :  { %2543 = vmatpush3.bf16.msra.mxu0 %v2981_v15  ;;  %2410 = vmatprep.mubr.msk.f32.mxu0 %vm2705_vm1, %v2706_v4 }
0x1966   :  { %2544 = vmatprep.subr.bf16.mxu0 %v2704_v0 }
0x1969   :  { %2546 = vmatpush3.bf16.msra.mxu0 %v2991_v18 }
0x196a   :  { %2553 = vmatprep.subr.bf16.mxu0 %v2704_v0 }
0x1a37   :  { %v1461_v32 = vpop.f32.mrb[22].mxu0 }
0x1a38   :  { %v1465_v33 = vadd.f32 %v1461_v32, %v1150_v31  ;;  %v2390_v13 = vpop.f32.mrb[23].mxu0 }
0x1a3a   :  { %v1467_v6 = vsub.f32 0.0, %v1465_v33 }
0x1a3c   :  { %v1468_v34 = vmul.f32 1.442695, %v1467_v6 }
0x1a3e   :  { %2656 = vpow2.f32 %v1468_v34  ;;  %v1165_v34 = vadd.f32 %v2963_v57, %v3017_v12 }
0x1a3f   :  { %2658 = vtanh.f32 %v1465_v33 }
0x1a48   :  { %v2657_v35 = vpop.eup %2656 }
0x1a49   :  { %v1470_v36 = vadd.f32 1.0, %v2657_v35  ;;  %v2659_v37 = vpop.eup %2658 }
0x1a4b   :  { %2660 = vrcp.f32 %v1470_v36 }
0x1a55   :  { %v2661_v38 = vpop.eup %2660 }
0x1a56   :  { %v1473_v39 = vsel %vm2814_vm4, %v2659_v37, %v2661_v38 }
0x1a57   :  { %1476 = vrot.lane.b32.xlu0 %v1473_v39, %s2707_s3  ;;  %v1474_v56 = vmul.f32 %v1473_v39, %v1382_v27 }
0x1ac9   :  { %v1477_v40 = vpop.permute.xlu0 %1476 }
0x1aca   :  { %v1479_v41 = vmul.f32 %v1477_v40, %v1473_v39 }
0x1acc   :  { %1481 = vrot.lane.b32.xlu1 %v1479_v41, %s2708_s25 }
0x1b3e   :  { %v1482_v42 = vpop.permute.xlu1 %1481 }
0x1b3f   :  { %v1484_v43 = vadd.f32 %v1482_v42, %v1474_v56 }
0x1b41   :  { %2662 = vtanh.f32 %v1484_v43 }
0x1b4b   :  { %v2663_v44 = vpop.eup %2662 }
0x1b4c   :  { %1487 = vrot.lane.b32.xlu0 %v2663_v44, %s2707_s3 }
0x1bbe   :  { %v1488_v45 = vpop.permute.xlu0 %1487 }
0x1bbf   :  { %v1490_v46 = vmul.f32 %v1488_v45, %v1473_v39 }
0x1bc1   :  { %1493 = vrot.lane.b32.xlu1 %v1490_v46, %s2708_s25 }
0x1c33   :  { %v1494_v47 = vpop.permute.xlu1 %1493 }
0x1c34   :  { %2400 = vmatmul.mubr.msk.f32.vlgmr.msra.gmra.mrb[14].mxu1 %vm197_vm5, %v1494_v47 }
0x1c35   :  { %2549 = vmatpush3.bf16.msra.mxu1 %v2981_v15  ;;  %2421 = vmatprep.mubr.msk.f32.mxu1 %vm2705_vm1, %v2706_v4 }
0x1c36   :  { %2550 = vmatprep.subr.bf16.mxu1 %v2704_v0 }
0x1c39   :  { %2552 = vmatpush3.bf16.msra.mxu1 %v2991_v18 }
0x1c3a   :  { %2559 = vmatprep.subr.bf16.mxu1 %v2704_v0 }
0x1d07   :  { %v1563_v49 = vpop.f32.mrb[14].mxu1 }
0x1d08   :  { %v1567_v50 = vadd.f32 %v1563_v49, %v1155_v48  ;;  %v2401_v51 = vpop.f32.mrb[15].mxu1 }
0x1d0a   :  { %v1569_v52 = vsub.f32 0.0, %v1567_v50 }
0x1d0c   :  { %v1570_v54 = vmul.f32 1.442695, %v1569_v52 }
0x1d0e   :  { %2664 = vpow2.f32 %v1570_v54 }
0x1d0f   :  { %2666 = vtanh.f32 %v1567_v50  ;;  %v1170_v50 = vadd.f32 %v3017_v12, %v3052_v8 }
0x1d18   :  { %v2665_v58 = vpop.eup %2664 }
0x1d19   :  { %v1572_v60 = vadd.f32 1.0, %v2665_v58  ;;  %v2667_v7 = vpop.eup %2666 }
0x1d1b   :  { %2668 = vrcp.f32 %v1572_v60 }
0x1d25   :  { %v2669_v61 = vpop.eup %2668 }
0x1d26   :  { %v1575_v62 = vsel %vm2814_vm4, %v2667_v7, %v2669_v61 }
0x1d27   :  { %1578 = vrot.lane.b32.xlu0 %v1575_v62, %s2707_s3  ;;  %v1576_v55 = vmul.f32 %v1575_v62, %v1484_v43 }
0x1d99   :  { %v1579_v63 = vpop.permute.xlu0 %1578 }
0x1d9a   :  { %v1581_v1 = vmul.f32 %v1579_v63, %v1575_v62 }
0x1d9c   :  { %1583 = vrot.lane.b32.xlu1 %v1581_v1, %s2708_s25 }
0x1e0e   :  { %v1584_v2 = vpop.permute.xlu1 %1583 }
0x1e0f   :  { %v1586_v5 = vadd.f32 %v1584_v2, %v1576_v55 }
0x1e11   :  { %2670 = vtanh.f32 %v1586_v5 }
0x1e1b   :  { %v2671_v9 = vpop.eup %2670 }
0x1e1c   :  { %1589 = vrot.lane.b32.xlu0 %v2671_v9, %s2707_s3 }
0x1e8e   :  { %v1590_v10 = vpop.permute.xlu0 %1589 }
0x1e8f   :  { %v1592_v11 = vmul.f32 %v1590_v10, %v1575_v62 }
0x1e91   :  { %1595 = vrot.lane.b32.xlu1 %v1592_v11, %s2708_s25 }
0x1f03   :  { %v1596_v14 = vpop.permute.xlu1 %1595 }
0x1f04   :  { %2411 = vmatmul.mubr.msk.f32.vlgmr.msra.gmra.mrb[24].mxu0 %vm197_vm5, %v1596_v14 }
0x1f05   :  { %2555 = vmatpush3.bf16.msra.mxu0 %v2981_v15  ;;  %2432 = vmatprep.mubr.msk.f32.mxu0 %vm2705_vm1, %v2706_v4 }
0x1f06   :  { %2556 = vmatprep.subr.bf16.mxu0 %v2704_v0 }
0x1f09   :  { %2558 = vmatpush3.bf16.msra.mxu0 %v2991_v18 }
0x1f0a   :  { %2565 = vmatprep.subr.bf16.mxu0 %v2704_v0 }
0x1fd7   :  { %v1665_v17 = vpop.f32.mrb[24].mxu0 }
0x1fd8   :  { %v1669_v19 = vadd.f32 %v1665_v17, %v1160_v16  ;;  %v2412_v20 = vpop.f32.mrb[25].mxu0  ;;  %v1175_v16 = vadd.f32 %v3050_v23, %v3017_v12 }
0x1fda   :  { %v1671_v53 = vsub.f32 0.0, %v1669_v19 }
0x1fdc   :  { %v1672_v21 = vmul.f32 1.442695, %v1671_v53 }
0x1fde   :  { %2672 = vpow2.f32 %v1672_v21 }
0x1fdf   :  { %2674 = vtanh.f32 %v1669_v19 }
0x1fe8   :  { %v2673_v22 = vpop.eup %2672 }
0x1fe9   :  { %v1674_v24 = vadd.f32 1.0, %v2673_v22  ;;  %v2675_v25 = vpop.eup %2674 }
0x1feb   :  { %2676 = vrcp.f32 %v1674_v24 }
0x1ff5   :  { %v2677_v27 = vpop.eup %2676 }
0x1ff6   :  { %v1677_v28 = vsel %vm2814_vm4, %v2675_v25, %v2677_v27 }
0x1ff7   :  { %1680 = vrot.lane.b32.xlu0 %v1677_v28, %s2707_s3  ;;  %v1678_v59 = vmul.f32 %v1677_v28, %v1586_v5 }
0x2069   :  { %v1681_v3 = vpop.permute.xlu0 %1680 }
0x206a   :  { %v1683_v29 = vmul.f32 %v1681_v3, %v1677_v28 }
0x206c   :  { %1685 = vrot.lane.b32.xlu1 %v1683_v29, %s2708_s25 }
0x20de   :  { %v1686_v30 = vpop.permute.xlu1 %1685 }
0x20df   :  { %v1688_v31 = vadd.f32 %v1686_v30, %v1678_v59  ;;  %v2001_v30 = vld [vmem:[%s3162_s7] sm:$0xff] }
0x20e1   :  { %2678 = vtanh.f32 %v1688_v31 }
0x20eb   :  { %v2679_v32 = vpop.eup %2678 }
0x20ec   :  { %1691 = vrot.lane.b32.xlu0 %v2679_v32, %s2707_s3 }
0x215e   :  { %v1692_v33 = vpop.permute.xlu0 %1691 }
0x215f   :  { %v1694_v13 = vmul.f32 %v1692_v33, %v1677_v28  ;;  %v2004_v33 = vld [vmem:[%s3162_s7 + $0x18] sm:$0xff] }
0x2161   :  { %1697 = vrot.lane.b32.xlu1 %v1694_v13, %s2708_s25  ;;  %v2569_v13 = vpack.c.bf16 %v2004_v33, %v2003_v26 }
0x21d3   :  { %v1698_v6 = vpop.permute.xlu1 %1697 }
0x21d4   :  { %2422 = vmatmul.mubr.msk.f32.vlgmr.msra.gmra.mrb[16].mxu1 %vm197_vm5, %v1698_v6 }
0x21d5   :  { %2561 = vmatpush3.bf16.msra.mxu1 %v2981_v15  ;;  %2443 = vmatprep.mubr.msk.f32.mxu1 %vm2705_vm1, %v2706_v4 }
0x21d6   :  { %2562 = vmatprep.subr.bf16.mxu1 %v2704_v0 }
0x21d9   :  { %2564 = vmatpush3.bf16.msra.mxu1 %v2991_v18 }
0x22a7   :  { %v1767_v35 = vpop.f32.mrb[16].mxu1 }
0x22a8   :  { %v1771_v36 = vadd.f32 %v1767_v35, %v1165_v34  ;;  %v2423_v37 = vpop.f32.mrb[17].mxu1 }
0x22a9   :  { %v2125_v37 = vld [vmem:[%s3163_s8] ss:$0 sm:$0xff] }
0x22aa   :  { %v1773_v38 = vsub.f32 0.0, %v1771_v36 }
0x22ac   :  { %v1774_v39 = vmul.f32 1.442695, %v1773_v38 }
0x22ae   :  { %2680 = vpow2.f32 %v1774_v39 }
0x22af   :  { %2682 = vtanh.f32 %v1771_v36 }
0x22b8   :  { %v2681_v40 = vpop.eup %2680 }
0x22b9   :  { %v1776_v41 = vadd.f32 1.0, %v2681_v40  ;;  %v2683_v15 = vpop.eup %2682 }
0x22bb   :  { %2684 = vrcp.f32 %v1776_v41 }
0x22c5   :  { %v2685_v56 = vpop.eup %2684 }
0x22c6   :  { %v1779_v42 = vsel %vm2814_vm4, %v2683_v15, %v2685_v56 }
0x22c7   :  { %1782 = vrot.lane.b32.xlu0 %v1779_v42, %s2707_s3  ;;  %v1780_v57 = vmul.f32 %v1779_v42, %v1688_v31  ;;  %v2002_v31 = vld [vmem:[%s3162_s7 + $0x8] sm:$0xff] }
0x22c8   :  { %v2566_v32 = vpack.c.bf16 %v2002_v31, %v2001_v30 }
0x2339   :  { %v1783_v18 = vpop.permute.xlu0 %1782 }
0x233a   :  { %v1785_v43 = vmul.f32 %v1783_v18, %v1779_v42 }
0x233c   :  { %1787 = vrot.lane.b32.xlu1 %v1785_v43, %s2708_s25 }
0x23ae   :  { %v1788_v44 = vpop.permute.xlu1 %1787 }
0x23af   :  { %v1790_v45 = vadd.f32 %v1788_v44, %v1780_v57 }
0x23b1   :  { %2686 = vtanh.f32 %v1790_v45 }
0x23bb   :  { %v2687_v46 = vpop.eup %2686 }
0x23bc   :  { %1793 = vrot.lane.b32.xlu0 %v2687_v46, %s2707_s3 }
0x242e   :  { %v1794_v47 = vpop.permute.xlu0 %1793 }
0x242f   :  { %v1796_v48 = vmul.f32 %v1794_v47, %v1779_v42 }
0x2431   :  { %1799 = vrot.lane.b32.xlu1 %v1796_v48, %s2708_s25 }
0x24a3   :  { %v1800_v49 = vpop.permute.xlu1 %1799 }
0x24a4   :  { %2433 = vmatmul.mubr.msk.f32.vlgmr.msra.gmra.mrb[26].mxu0 %vm197_vm5, %v1800_v49 }
0x24a5   :  { %2454 = vmatprep.mubr.msk.f32.mxu0 %vm2705_vm1, %v2706_v4  ;;  %2567 = vmatpush3.bf16.msra.mxu0 %v2566_v32 }
0x24a6   :  { %2568 = vmatprep.subr.bf16.mxu0 %v2704_v0 }
0x24a9   :  { %2570 = vmatpush3.bf16.msra.mxu0 %v2569_v13 }
0x2577   :  { %v1869_v51 = vpop.f32.mrb[26].mxu0 }
0x2578   :  { %v1873_v52 = vadd.f32 %v1869_v51, %v1170_v50  ;;  %v2434_v54 = vpop.f32.mrb[27].mxu0 }
0x257a   :  { %v1875_v58 = vsub.f32 0.0, %v1873_v52 }
0x257c   :  { %v1876_v60 = vmul.f32 1.442695, %v1875_v58 }
0x257e   :  { %2688 = vpow2.f32 %v1876_v60 }
0x257f   :  { %2690 = vtanh.f32 %v1873_v52 }
0x2588   :  { %v2689_v7 = vpop.eup %2688 }
0x2589   :  { %v1878_v61 = vadd.f32 1.0, %v2689_v7  ;;  %v2691_v62 = vpop.eup %2690 }
0x258b   :  { %2692 = vrcp.f32 %v1878_v61 }
0x2595   :  { %v2693_v63 = vpop.eup %2692 }
0x2596   :  { %v1881_v1 = vsel %vm2814_vm4, %v2691_v62, %v2693_v63 }
0x2597   :  { %1884 = vrot.lane.b32.xlu0 %v1881_v1, %s2707_s3  ;;  %v1882_v8 = vmul.f32 %v1881_v1, %v1790_v45 }
0x2609   :  { %v1885_v4 = vpop.permute.xlu0 %1884 }
0x260a   :  { %v1887_v55 = vmul.f32 %v1885_v4, %v1881_v1 }
0x260c   :  { %1889 = vrot.lane.b32.xlu1 %v1887_v55, %s2708_s25 }
0x267e   :  { %v1890_v2 = vpop.permute.xlu1 %1889 }
0x267f   :  { %v1892_v5 = vadd.f32 %v1890_v2, %v1882_v8 }
0x2681   :  { %2694 = vtanh.f32 %v1892_v5 }
0x268b   :  { %v2695_v9 = vpop.eup %2694 }
0x268c   :  { %1895 = vrot.lane.b32.xlu0 %v2695_v9, %s2707_s3 }
0x26fe   :  { %v1896_v10 = vpop.permute.xlu0 %1895 }
0x26ff   :  { %v1898_v11 = vmul.f32 %v1896_v10, %v1881_v1 }
0x2701   :  { %1901 = vrot.lane.b32.xlu1 %v1898_v11, %s2708_s25 }
0x2773   :  { %v1902_v14 = vpop.permute.xlu1 %1901 }
0x2774   :  { %2444 = vmatmul.mubr.msk.f32.vlgmr.msra.gmra.mrb[18].mxu1 %vm197_vm5, %v1902_v14 }
0x2847   :  { %v1971_v17 = vpop.f32.mrb[18].mxu1 }
0x2848   :  { %v1975_v19 = vadd.f32 %v1971_v17, %v1175_v16  ;;  %v2445_v20 = vpop.f32.mrb[19].mxu1 }
0x284a   :  { %v1977_v53 = vsub.f32 0.0, %v1975_v19 }
0x284c   :  { %v1978_v21 = vmul.f32 1.442695, %v1977_v53 }
0x284e   :  { %2696 = vpow2.f32 %v1978_v21 }
0x284f   :  { %2698 = vtanh.f32 %v1975_v19 }
0x2858   :  { %v2697_v22 = vpop.eup %2696 }
0x2859   :  { %v1980_v24 = vadd.f32 1.0, %v2697_v22  ;;  %v2699_v25 = vpop.eup %2698 }
0x285b   :  { %2700 = vrcp.f32 %v1980_v24 }
0x2865   :  { %v2701_v27 = vpop.eup %2700 }
0x2866   :  { %v1983_v28 = vsel %vm2814_vm4, %v2699_v25, %v2701_v27 }
0x2867   :  { %1986 = vrot.lane.b32.xlu0 %v1983_v28, %s2707_s3  ;;  %v1984_v12 = vmul.f32 %v1983_v28, %v1892_v5 }
0x28d9   :  { %v1987_v3 = vpop.permute.xlu0 %1986 }
0x28da   :  { %v1989_v29 = vmul.f32 %v1987_v3, %v1983_v28 }
0x28dc   :  { %1991 = vrot.lane.b32.xlu1 %v1989_v29, %s2708_s25 }
0x294e   :  { %v1992_v23 = vpop.permute.xlu1 %1991 }
0x294f   :  { %v1994_v59 = vadd.f32 %v1992_v23, %v1984_v12 }
0x2951   :  { %2702 = vtanh.f32 %v1994_v59 }
0x295b   :  { %v2703_v6 = vpop.eup %2702 }
0x295c   :  { %1997 = vrot.lane.b32.xlu0 %v2703_v6, %s2707_s3 }
0x29ce   :  { %v1998_v34 = vpop.permute.xlu0 %1997 }
0x29cf   :  { %v2000_v35 = vmul.f32 %v1998_v34, %v1983_v28 }
0x29d1   :  { %2013 = vrot.lane.b32.xlu1 %v2000_v35, %s2708_s25 }
0x2a43   :  { %v2014_v36 = vpop.permute.xlu1 %2013 }
0x2a44   :  { %2455 = vmatmul.mubr.msk.f32.vlgmr.msra.gmra.mrb[28].mxu0 %vm197_vm5, %v2014_v36 }
0x2b17   :  { %v2083_v38 = vpop.f32.mrb[28].mxu0 }
0x2b18   :  { %v2084_v39 = vadd.f32 %v2125_v37, %v2083_v38  ;;  %v2456_v40 = vpop.f32.mrb[29].mxu0 }
0x2b1a   :  { %2088 = vst.msk [vmem:[%s3164_s9] sm:$0xff] %vm2087_vm6, %v2084_v39 }

</bundles_post_ra>
